<compile_context>
chip_gen: v6e
topology: v6e:2x2x1
jax: 0.10.0
libtpu: 0.0.40
codegen_flags: <defaults>
</compile_context>

<pallas_src>
import functools

import jax
import jax.numpy as jnp
from jax import lax
from jax.experimental import pallas as pl
from jax.experimental.pallas import tpu as pltpu

BN_EPS = 1e-5


def _conv_stats_kernel(xph_ref, w_ref, y_ref, stats_ref, *, kh, kw, stride, oh, ow):
    """Per-image fused conv (as shifted matmuls) + partial BN statistics.

    xph_ref  : (stride*stride, PH, PW, Cin)   phase-decomposed padded image
    w_ref    : (kh*kw, Cin, Cout_pad)          resident across the grid
    y_ref    : (1, oh*ow, Cout_pad)            raw conv output (lane-dense)
    stats_ref: (1, 2, Cout_pad)                row 0 = sum, row 1 = sum of squares
    """
    ohw = oh * ow
    cin = xph_ref.shape[-1]
    cpad = w_ref.shape[-1]

    acc = jnp.zeros((ohw, cpad), jnp.float32)
    for ki in range(kh):
        for kj in range(kw):
            p = (ki % stride) * stride + (kj % stride)
            hi = ki // stride
            wj = kj // stride
            tap = xph_ref[p, hi:hi + oh, wj:wj + ow, :]        # (oh, ow, cin)
            tap2 = tap.reshape(ohw, cin)
            acc = acc + jnp.dot(tap2, w_ref[ki * kw + kj],
                                preferred_element_type=jnp.float32)

    y_ref[0] = acc
    stats_ref[0, 0:1, :] = jnp.sum(acc, axis=0, keepdims=True)
    stats_ref[0, 1:2, :] = jnp.sum(acc * acc, axis=0, keepdims=True)


def _bn_relu_kernel(y_ref, scale_ref, shift_ref, o_ref):
    # y_ref: (1, OHW, Cout_pad); scale/shift: (1, 1, Cout_pad) (resident)
    o_ref[...] = jnp.maximum(y_ref[...] * scale_ref[...] + shift_ref[...], 0.0)


@functools.partial(jax.jit, static_argnames=("stride", "padding"))
def block_forward(x_nchw, conv_weight, gamma, beta, stride=1, padding=0):
    """x_nchw: (N, Cin, H, W); conv_weight: (Cout, Cin, 3, 3) (PyTorch layout)."""
    N, Cin, H, W = x_nchw.shape
    Cout, _, KH, KW = conv_weight.shape
    s = int(stride)

    Hp, Wp = H + 2 * padding, W + 2 * padding
    OH = (Hp - KH) // s + 1
    OW = (Wp - KW) // s + 1
    OHW = OH * OW
    Cpad = ((Cout + 127) // 128) * 128          # lane-dense output channels
    s2 = s * s
    PH = -(-Hp // s)
    PW = -(-Wp // s)

    # ---- glue: NCHW -> NHWC, pad, stride-phase decomposition (1x input bytes) ----
    x_nhwc = jnp.transpose(x_nchw, (0, 2, 3, 1)).astype(jnp.float32)
    xp = jnp.pad(x_nhwc, ((0, 0), (padding, padding), (padding, padding), (0, 0)))

    phases = []
    for a in range(s):
        for b in range(s):
            ph = xp[:, a::s, b::s, :]
            ph = jnp.pad(ph, ((0, 0),
                              (0, PH - ph.shape[1]),
                              (0, PW - ph.shape[2]),
                              (0, 0)))
            phases.append(ph)
    xph = jnp.stack(phases, axis=1).reshape(N * s2, PH, PW, Cin)

    # weight (Cout, Cin, KH, KW) -> (KH*KW, Cin, Cout) -> pad Cout to Cpad
    w = jnp.transpose(conv_weight, (2, 3, 1, 0)).reshape(KH * KW, Cin, Cout)
    w = jnp.pad(w.astype(jnp.float32), ((0, 0), (0, 0), (0, Cpad - Cout)))
    gpad = jnp.pad(gamma.astype(jnp.float32), (0, Cpad - Cout))
    bpad = jnp.pad(beta.astype(jnp.float32), (0, Cpad - Cout))

    # ---- pass 1: conv + partial BN stats, grid over images ("M" tiles) ----
    kernel1 = functools.partial(_conv_stats_kernel,
                                kh=KH, kw=KW, stride=s, oh=OH, ow=OW)
    flops = 2 * N * OHW * (KH * KW * Cin) * Cpad
    bytes_acc = 4 * (xph.size + w.size + N * OHW * Cpad + N * 2 * Cpad)

    y, stats = pl.pallas_call(
        kernel1,
        out_shape=(
            jax.ShapeDtypeStruct((N, OHW, Cpad), jnp.float32),
            jax.ShapeDtypeStruct((N, 2, Cpad), jnp.float32),
        ),
        grid=(N,),
        in_specs=[
            pl.BlockSpec((s2, PH, PW, Cin), lambda n: (n, 0, 0, 0)),
            pl.BlockSpec((KH * KW, Cin, Cpad), lambda n: (0, 0, 0)),   # resident
        ],
        out_specs=(
            pl.BlockSpec((1, OHW, Cpad), lambda n: (n, 0, 0)),
            pl.BlockSpec((1, 2, Cpad), lambda n: (n, 0, 0)),
        ),
        compiler_params=pltpu.CompilerParams(dimension_semantics=("parallel",)),
        cost_estimate=pl.CostEstimate(flops=flops, transcendentals=0,
                                      bytes_accessed=bytes_acc),
    )(xph, w)

    # ---- tiny per-channel finalize (global batch statistics), folded affine ----
    count = float(N * OHW)
    ssum = jnp.sum(stats[:, 0, :], axis=0)
    ssq = jnp.sum(stats[:, 1, :], axis=0)
    mean = ssum / count
    var = jnp.maximum(ssq / count - mean * mean, 0.0)      # biased variance
    scale = gpad * lax.rsqrt(var + BN_EPS)
    shift = bpad - mean * scale
    scale3 = scale.reshape(1, 1, Cpad)
    shift3 = shift.reshape(1, 1, Cpad)

    # ---- pass 2: y * scale + shift, ReLU (single FMA + max per element) ----
    out_flat = pl.pallas_call(
        _bn_relu_kernel,
        out_shape=jax.ShapeDtypeStruct((N, OHW, Cpad), jnp.float32),
        grid=(N,),
        in_specs=[
            pl.BlockSpec((1, OHW, Cpad), lambda n: (n, 0, 0)),
            pl.BlockSpec((1, 1, Cpad), lambda n: (0, 0, 0)),
            pl.BlockSpec((1, 1, Cpad), lambda n: (0, 0, 0)),
        ],
        out_specs=pl.BlockSpec((1, OHW, Cpad), lambda n: (n, 0, 0)),
        compiler_params=pltpu.CompilerParams(dimension_semantics=("parallel",)),
    )(y, scale3, shift3)

    out = out_flat[:, :, :Cout].reshape(N, OH, OW, Cout)
    return jnp.transpose(out, (0, 3, 1, 2))                 # back to NCHW


def _reference(x_nchw, conv_weight, gamma, beta, stride, padding):
    y = lax.conv_general_dilated(
        x_nchw.astype(jnp.float32), conv_weight.astype(jnp.float32),
        window_strides=(stride, stride),
        padding=[(padding, padding), (padding, padding)],
        dimension_numbers=("NCHW", "OIHW", "NCHW"),
    )
    mean = jnp.mean(y, axis=(0, 2, 3), keepdims=True)
    var = jnp.mean((y - mean) ** 2, axis=(0, 2, 3), keepdims=True)
    y_hat = (y - mean) * lax.rsqrt(var + BN_EPS)
    out = y_hat * gamma.reshape(1, -1, 1, 1) + beta.reshape(1, -1, 1, 1)
    return jnp.maximum(out, 0.0)


if __name__ == "__main__":
    N, Cin, H, W = 2, 4, 16, 16
    Cout = 8

    key = jax.random.PRNGKey(0)
    kx, kw = jax.random.split(key)
    x = jax.random.normal(kx, (N, Cin, H, W), dtype=jnp.float32)

    # Xavier-uniform init for conv weight (Cout, Cin, 3, 3), gain=1.
    fan_in = Cin * 3 * 3
    fan_out = Cout * 3 * 3
    bound = (6.0 / (fan_in + fan_out)) ** 0.5
    conv_weight = jax.random.uniform(
        kw, (Cout, Cin, 3, 3), minval=-bound, maxval=bound, dtype=jnp.float32)

    # BatchNorm2d default params.
    gamma = jnp.ones((Cout,), jnp.float32)
    beta = jnp.zeros((Cout,), jnp.float32)

    # Check both the default-style (stride=1) and a strided configuration.
    for (stride, padding) in [(1, 1), (2, 1)]:
        out = block_forward(x, conv_weight, gamma, beta,
                            stride=stride, padding=padding)
        out = jax.block_until_ready(out)
        ref = _reference(x, conv_weight, gamma, beta, stride, padding)
        OH = (H + 2 * padding - 3) // stride + 1
        assert out.shape == (N, Cout, OH, OH), out.shape
        err = float(jnp.max(jnp.abs(out - ref)))
        assert jnp.allclose(out, ref, atol=1e-4, rtol=1e-4), err

    print("KERNEL_OK")
</pallas_src>

<mosaic_0001>
module attributes {stable_mosaic.version = 11 : i64} {
  func.func @_conv_stats_kernel(%arg0: i32, %arg1: memref<1x18x18x4xf32, #tpu.memory_space<vmem>>, %arg2: memref<9x4x128xf32, #tpu.memory_space<vmem>>, %arg3: memref<1x256x128xf32, #tpu.memory_space<vmem>>, %arg4: memref<1x2x128xf32, #tpu.memory_space<vmem>>) attributes {dimension_semantics = [#tpu.dimension_semantics<parallel>], iteration_bounds = array<i64: 2>, scalar_prefetch = 0 : i64, scratch_operands = 0 : i64, tpu.core_type = #tpu.core_type<tc>, window_params = [{transform_indices = @transform_0, window_bounds = array<i64: 1, 18, 18, 4>}, {pipeline_mode = #tpu.pipeline_mode<synchronous>, transform_indices = @transform_1, window_bounds = array<i64: 9, 4, 128>}, {transform_indices = @transform_2, window_bounds = array<i64: 1, 256, 128>}, {transform_indices = @transform_3, window_bounds = array<i64: 1, 2, 128>}]} {
    %cst = arith.constant 0.000000e+00 : f32
    %0 = vector.broadcast %cst : f32 to vector<256x128xf32>
    %c0 = arith.constant 0 : index
    %c0_0 = arith.constant 0 : index
    %c0_1 = arith.constant 0 : index
    %c0_2 = arith.constant 0 : index
    %1 = vector.load %arg1[%c0, %c0_0, %c0_1, %c0_2] : memref<1x18x18x4xf32, #tpu.memory_space<vmem>>, vector<1x16x16x4xf32>
    %2 = vector.shape_cast %1 : vector<1x16x16x4xf32> to vector<16x16x4xf32>
    %3 = vector.shape_cast %2 : vector<16x16x4xf32> to vector<256x4xf32>
    %c0_3 = arith.constant 0 : index
    %c0_4 = arith.constant 0 : index
    %c0_5 = arith.constant 0 : index
    %4 = vector.load %arg2[%c0_3, %c0_4, %c0_5] : memref<9x4x128xf32, #tpu.memory_space<vmem>>, vector<1x4x128xf32>
    %5 = vector.shape_cast %4 : vector<1x4x128xf32> to vector<4x128xf32>
    %cst_6 = arith.constant dense<0.000000e+00> : vector<256x128xf32>
    %6 = tpu.matmul %3, %5, %cst_6 {dimension_numbers = #tpu.dot_dimension_numbers<[1], [0], [0], [1], [0, 0, 1, 1], [], []>} : vector<256x4xf32>, vector<4x128xf32>, vector<256x128xf32> -> vector<256x128xf32>
    %7 = arith.addf %0, %6 : vector<256x128xf32>
    %c0_7 = arith.constant 0 : index
    %c0_8 = arith.constant 0 : index
    %c1 = arith.constant 1 : index
    %c0_9 = arith.constant 0 : index
    %8 = vector.load %arg1[%c0_7, %c0_8, %c1, %c0_9] : memref<1x18x18x4xf32, #tpu.memory_space<vmem>>, vector<1x16x16x4xf32>
    %9 = vector.shape_cast %8 : vector<1x16x16x4xf32> to vector<16x16x4xf32>
    %10 = vector.shape_cast %9 : vector<16x16x4xf32> to vector<256x4xf32>
    %c1_10 = arith.constant 1 : index
    %c0_11 = arith.constant 0 : index
    %c0_12 = arith.constant 0 : index
    %11 = vector.load %arg2[%c1_10, %c0_11, %c0_12] : memref<9x4x128xf32, #tpu.memory_space<vmem>>, vector<1x4x128xf32>
    %12 = vector.shape_cast %11 : vector<1x4x128xf32> to vector<4x128xf32>
    %cst_13 = arith.constant dense<0.000000e+00> : vector<256x128xf32>
    %13 = tpu.matmul %10, %12, %cst_13 {dimension_numbers = #tpu.dot_dimension_numbers<[1], [0], [0], [1], [0, 0, 1, 1], [], []>} : vector<256x4xf32>, vector<4x128xf32>, vector<256x128xf32> -> vector<256x128xf32>
    %14 = arith.addf %7, %13 : vector<256x128xf32>
    %c0_14 = arith.constant 0 : index
    %c0_15 = arith.constant 0 : index
    %c2 = arith.constant 2 : index
    %c0_16 = arith.constant 0 : index
    %15 = vector.load %arg1[%c0_14, %c0_15, %c2, %c0_16] : memref<1x18x18x4xf32, #tpu.memory_space<vmem>>, vector<1x16x16x4xf32>
    %16 = vector.shape_cast %15 : vector<1x16x16x4xf32> to vector<16x16x4xf32>
    %17 = vector.shape_cast %16 : vector<16x16x4xf32> to vector<256x4xf32>
    %c2_17 = arith.constant 2 : index
    %c0_18 = arith.constant 0 : index
    %c0_19 = arith.constant 0 : index
    %18 = vector.load %arg2[%c2_17, %c0_18, %c0_19] : memref<9x4x128xf32, #tpu.memory_space<vmem>>, vector<1x4x128xf32>
    %19 = vector.shape_cast %18 : vector<1x4x128xf32> to vector<4x128xf32>
    %cst_20 = arith.constant dense<0.000000e+00> : vector<256x128xf32>
    %20 = tpu.matmul %17, %19, %cst_20 {dimension_numbers = #tpu.dot_dimension_numbers<[1], [0], [0], [1], [0, 0, 1, 1], [], []>} : vector<256x4xf32>, vector<4x128xf32>, vector<256x128xf32> -> vector<256x128xf32>
    %21 = arith.addf %14, %20 : vector<256x128xf32>
    %c0_21 = arith.constant 0 : index
    %c1_22 = arith.constant 1 : index
    %c0_23 = arith.constant 0 : index
    %c0_24 = arith.constant 0 : index
    %22 = vector.load %arg1[%c0_21, %c1_22, %c0_23, %c0_24] : memref<1x18x18x4xf32, #tpu.memory_space<vmem>>, vector<1x16x16x4xf32>
    %23 = vector.shape_cast %22 : vector<1x16x16x4xf32> to vector<16x16x4xf32>
    %24 = vector.shape_cast %23 : vector<16x16x4xf32> to vector<256x4xf32>
    %c3 = arith.constant 3 : index
    %c0_25 = arith.constant 0 : index
    %c0_26 = arith.constant 0 : index
    %25 = vector.load %arg2[%c3, %c0_25, %c0_26] : memref<9x4x128xf32, #tpu.memory_space<vmem>>, vector<1x4x128xf32>
    %26 = vector.shape_cast %25 : vector<1x4x128xf32> to vector<4x128xf32>
    %cst_27 = arith.constant dense<0.000000e+00> : vector<256x128xf32>
    %27 = tpu.matmul %24, %26, %cst_27 {dimension_numbers = #tpu.dot_dimension_numbers<[1], [0], [0], [1], [0, 0, 1, 1], [], []>} : vector<256x4xf32>, vector<4x128xf32>, vector<256x128xf32> -> vector<256x128xf32>
    %28 = arith.addf %21, %27 : vector<256x128xf32>
    %c0_28 = arith.constant 0 : index
    %c1_29 = arith.constant 1 : index
    %c1_30 = arith.constant 1 : index
    %c0_31 = arith.constant 0 : index
    %29 = vector.load %arg1[%c0_28, %c1_29, %c1_30, %c0_31] : memref<1x18x18x4xf32, #tpu.memory_space<vmem>>, vector<1x16x16x4xf32>
    %30 = vector.shape_cast %29 : vector<1x16x16x4xf32> to vector<16x16x4xf32>
    %31 = vector.shape_cast %30 : vector<16x16x4xf32> to vector<256x4xf32>
    %c4 = arith.constant 4 : index
    %c0_32 = arith.constant 0 : index
    %c0_33 = arith.constant 0 : index
    %32 = vector.load %arg2[%c4, %c0_32, %c0_33] : memref<9x4x128xf32, #tpu.memory_space<vmem>>, vector<1x4x128xf32>
    %33 = vector.shape_cast %32 : vector<1x4x128xf32> to vector<4x128xf32>
    %cst_34 = arith.constant dense<0.000000e+00> : vector<256x128xf32>
    %34 = tpu.matmul %31, %33, %cst_34 {dimension_numbers = #tpu.dot_dimension_numbers<[1], [0], [0], [1], [0, 0, 1, 1], [], []>} : vector<256x4xf32>, vector<4x128xf32>, vector<256x128xf32> -> vector<256x128xf32>
    %35 = arith.addf %28, %34 : vector<256x128xf32>
    %c0_35 = arith.constant 0 : index
    %c1_36 = arith.constant 1 : index
    %c2_37 = arith.constant 2 : index
    %c0_38 = arith.constant 0 : index
    %36 = vector.load %arg1[%c0_35, %c1_36, %c2_37, %c0_38] : memref<1x18x18x4xf32, #tpu.memory_space<vmem>>, vector<1x16x16x4xf32>
    %37 = vector.shape_cast %36 : vector<1x16x16x4xf32> to vector<16x16x4xf32>
    %38 = vector.shape_cast %37 : vector<16x16x4xf32> to vector<256x4xf32>
    %c5 = arith.constant 5 : index
    %c0_39 = arith.constant 0 : index
    %c0_40 = arith.constant 0 : index
    %39 = vector.load %arg2[%c5, %c0_39, %c0_40] : memref<9x4x128xf32, #tpu.memory_space<vmem>>, vector<1x4x128xf32>
    %40 = vector.shape_cast %39 : vector<1x4x128xf32> to vector<4x128xf32>
    %cst_41 = arith.constant dense<0.000000e+00> : vector<256x128xf32>
    %41 = tpu.matmul %38, %40, %cst_41 {dimension_numbers = #tpu.dot_dimension_numbers<[1], [0], [0], [1], [0, 0, 1, 1], [], []>} : vector<256x4xf32>, vector<4x128xf32>, vector<256x128xf32> -> vector<256x128xf32>
    %42 = arith.addf %35, %41 : vector<256x128xf32>
    %c0_42 = arith.constant 0 : index
    %c2_43 = arith.constant 2 : index
    %c0_44 = arith.constant 0 : index
    %c0_45 = arith.constant 0 : index
    %43 = vector.load %arg1[%c0_42, %c2_43, %c0_44, %c0_45] : memref<1x18x18x4xf32, #tpu.memory_space<vmem>>, vector<1x16x16x4xf32>
    %44 = vector.shape_cast %43 : vector<1x16x16x4xf32> to vector<16x16x4xf32>
    %45 = vector.shape_cast %44 : vector<16x16x4xf32> to vector<256x4xf32>
    %c6 = arith.constant 6 : index
    %c0_46 = arith.constant 0 : index
    %c0_47 = arith.constant 0 : index
    %46 = vector.load %arg2[%c6, %c0_46, %c0_47] : memref<9x4x128xf32, #tpu.memory_space<vmem>>, vector<1x4x128xf32>
    %47 = vector.shape_cast %46 : vector<1x4x128xf32> to vector<4x128xf32>
    %cst_48 = arith.constant dense<0.000000e+00> : vector<256x128xf32>
    %48 = tpu.matmul %45, %47, %cst_48 {dimension_numbers = #tpu.dot_dimension_numbers<[1], [0], [0], [1], [0, 0, 1, 1], [], []>} : vector<256x4xf32>, vector<4x128xf32>, vector<256x128xf32> -> vector<256x128xf32>
    %49 = arith.addf %42, %48 : vector<256x128xf32>
    %c0_49 = arith.constant 0 : index
    %c2_50 = arith.constant 2 : index
    %c1_51 = arith.constant 1 : index
    %c0_52 = arith.constant 0 : index
    %50 = vector.load %arg1[%c0_49, %c2_50, %c1_51, %c0_52] : memref<1x18x18x4xf32, #tpu.memory_space<vmem>>, vector<1x16x16x4xf32>
    %51 = vector.shape_cast %50 : vector<1x16x16x4xf32> to vector<16x16x4xf32>
    %52 = vector.shape_cast %51 : vector<16x16x4xf32> to vector<256x4xf32>
    %c7 = arith.constant 7 : index
    %c0_53 = arith.constant 0 : index
    %c0_54 = arith.constant 0 : index
    %53 = vector.load %arg2[%c7, %c0_53, %c0_54] : memref<9x4x128xf32, #tpu.memory_space<vmem>>, vector<1x4x128xf32>
    %54 = vector.shape_cast %53 : vector<1x4x128xf32> to vector<4x128xf32>
    %cst_55 = arith.constant dense<0.000000e+00> : vector<256x128xf32>
    %55 = tpu.matmul %52, %54, %cst_55 {dimension_numbers = #tpu.dot_dimension_numbers<[1], [0], [0], [1], [0, 0, 1, 1], [], []>} : vector<256x4xf32>, vector<4x128xf32>, vector<256x128xf32> -> vector<256x128xf32>
    %56 = arith.addf %49, %55 : vector<256x128xf32>
    %c0_56 = arith.constant 0 : index
    %c2_57 = arith.constant 2 : index
    %c2_58 = arith.constant 2 : index
    %c0_59 = arith.constant 0 : index
    %57 = vector.load %arg1[%c0_56, %c2_57, %c2_58, %c0_59] : memref<1x18x18x4xf32, #tpu.memory_space<vmem>>, vector<1x16x16x4xf32>
    %58 = vector.shape_cast %57 : vector<1x16x16x4xf32> to vector<16x16x4xf32>
    %59 = vector.shape_cast %58 : vector<16x16x4xf32> to vector<256x4xf32>
    %c8 = arith.constant 8 : index
    %c0_60 = arith.constant 0 : index
    %c0_61 = arith.constant 0 : index
    %60 = vector.load %arg2[%c8, %c0_60, %c0_61] : memref<9x4x128xf32, #tpu.memory_space<vmem>>, vector<1x4x128xf32>
    %61 = vector.shape_cast %60 : vector<1x4x128xf32> to vector<4x128xf32>
    %cst_62 = arith.constant dense<0.000000e+00> : vector<256x128xf32>
    %62 = tpu.matmul %59, %61, %cst_62 {dimension_numbers = #tpu.dot_dimension_numbers<[1], [0], [0], [1], [0, 0, 1, 1], [], []>} : vector<256x4xf32>, vector<4x128xf32>, vector<256x128xf32> -> vector<256x128xf32>
    %63 = arith.addf %56, %62 : vector<256x128xf32>
    %c0_63 = arith.constant 0 : index
    %c0_64 = arith.constant 0 : index
    %c0_65 = arith.constant 0 : index
    %64 = vector.load %arg3[%c0_63, %c0_64, %c0_65] : memref<1x256x128xf32, #tpu.memory_space<vmem>>, vector<1x256x128xf32>
    %65 = vector.shape_cast %64 : vector<1x256x128xf32> to vector<256x128xf32>
    %66 = vector.shape_cast %63 : vector<256x128xf32> to vector<1x256x128xf32>
    tpu.vector_store %arg3[%c0_63, %c0_64, %c0_65], %66 {strides = array<i32>} : memref<1x256x128xf32, #tpu.memory_space<vmem>>, vector<1x256x128xf32>,
    %cst_66 = arith.constant dense<0.000000e+00> : vector<128xf32>
    %67 = vector.multi_reduction <add>, %63, %cst_66 [0] : vector<256x128xf32> to vector<128xf32>
    %68 = vector.shape_cast %67 : vector<128xf32> to vector<1x128xf32>
    %c0_67 = arith.constant 0 : index
    %c0_68 = arith.constant 0 : index
    %c0_69 = arith.constant 0 : index
    %69 = vector.load %arg4[%c0_67, %c0_68, %c0_69] : memref<1x2x128xf32, #tpu.memory_space<vmem>>, vector<1x1x128xf32>
    %70 = vector.shape_cast %69 : vector<1x1x128xf32> to vector<1x128xf32>
    %71 = vector.shape_cast %68 : vector<1x128xf32> to vector<1x1x128xf32>
    tpu.vector_store %arg4[%c0_67, %c0_68, %c0_69], %71 {strides = array<i32>} : memref<1x2x128xf32, #tpu.memory_space<vmem>>, vector<1x1x128xf32>,
    %72 = arith.mulf %63, %63 : vector<256x128xf32>
    %cst_70 = arith.constant dense<0.000000e+00> : vector<128xf32>
    %73 = vector.multi_reduction <add>, %72, %cst_70 [0] : vector<256x128xf32> to vector<128xf32>
    %74 = vector.shape_cast %73 : vector<128xf32> to vector<1x128xf32>
    %c0_71 = arith.constant 0 : index
    %c1_72 = arith.constant 1 : index
    %c0_73 = arith.constant 0 : index
    %75 = vector.load %arg4[%c0_71, %c1_72, %c0_73] : memref<1x2x128xf32, #tpu.memory_space<vmem>>, vector<1x1x128xf32>
    %76 = vector.shape_cast %75 : vector<1x1x128xf32> to vector<1x128xf32>
    %77 = vector.shape_cast %74 : vector<1x128xf32> to vector<1x1x128xf32>
    tpu.vector_store %arg4[%c0_71, %c1_72, %c0_73], %77 {strides = array<i32>} : memref<1x2x128xf32, #tpu.memory_space<vmem>>, vector<1x1x128xf32>,
    return
  }
  func.func @transform_0(%arg0: i32) -> (i32, i32, i32, i32) {
    %c0_i32 = arith.constant 0 : i32
    %c0_i32_0 = arith.constant 0 : i32
    %c0_i32_1 = arith.constant 0 : i32
    %c0_i32_2 = arith.constant 0 : i32
    return %arg0, %c0_i32, %c0_i32_0, %c0_i32_1 : i32, i32, i32, i32
  }
  func.func @transform_1(%arg0: i32) -> (i32, i32, i32) {
    %c0_i32 = arith.constant 0 : i32
    %c0_i32_0 = arith.constant 0 : i32
    %c0_i32_1 = arith.constant 0 : i32
    %c0_i32_2 = arith.constant 0 : i32
    return %c0_i32, %c0_i32_0, %c0_i32_1 : i32, i32, i32
  }
  func.func @transform_2(%arg0: i32) -> (i32, i32, i32) {
    %c0_i32 = arith.constant 0 : i32
    %c0_i32_0 = arith.constant 0 : i32
    %c0_i32_1 = arith.constant 0 : i32
    return %arg0, %c0_i32, %c0_i32_0 : i32, i32, i32
  }
  func.func @transform_3(%arg0: i32) -> (i32, i32, i32) {
    %c0_i32 = arith.constant 0 : i32
    %c0_i32_0 = arith.constant 0 : i32
    %c0_i32_1 = arith.constant 0 : i32
    return %arg0, %c0_i32, %c0_i32_0 : i32, i32, i32
  }
}

module attributes {stable_mosaic.version = 11 : i64} {
  func.func @_bn_relu_kernel(%arg0: i32, %arg1: memref<1x256x128xf32, #tpu.memory_space<vmem>>, %arg2: memref<1x1x128xf32, #tpu.memory_space<vmem>>, %arg3: memref<1x1x128xf32, #tpu.memory_space<vmem>>, %arg4: memref<1x256x128xf32, #tpu.memory_space<vmem>>) attributes {dimension_semantics = [#tpu.dimension_semantics<parallel>], iteration_bounds = array<i64: 2>, scalar_prefetch = 0 : i64, scratch_operands = 0 : i64, tpu.core_type = #tpu.core_type<tc>, window_params = [{transform_indices = @transform_0, window_bounds = array<i64: 1, 256, 128>}, {pipeline_mode = #tpu.pipeline_mode<synchronous>, transform_indices = @transform_1, window_bounds = array<i64: 1, 1, 128>}, {pipeline_mode = #tpu.pipeline_mode<synchronous>, transform_indices = @transform_2, window_bounds = array<i64: 1, 1, 128>}, {transform_indices = @transform_3, window_bounds = array<i64: 1, 256, 128>}]} {
    %c0 = arith.constant 0 : index
    %c0_0 = arith.constant 0 : index
    %c0_1 = arith.constant 0 : index
    %0 = vector.load %arg1[%c0, %c0_0, %c0_1] : memref<1x256x128xf32, #tpu.memory_space<vmem>>, vector<1x256x128xf32>
    %c0_2 = arith.constant 0 : index
    %c0_3 = arith.constant 0 : index
    %c0_4 = arith.constant 0 : index
    %1 = vector.load %arg2[%c0_2, %c0_3, %c0_4] : memref<1x1x128xf32, #tpu.memory_space<vmem>>, vector<1x1x128xf32>
    %2 = vector.broadcast %1 : vector<1x1x128xf32> to vector<1x256x128xf32>
    %3 = arith.mulf %0, %2 : vector<1x256x128xf32>
    %c0_5 = arith.constant 0 : index
    %c0_6 = arith.constant 0 : index
    %c0_7 = arith.constant 0 : index
    %4 = vector.load %arg3[%c0_5, %c0_6, %c0_7] : memref<1x1x128xf32, #tpu.memory_space<vmem>>, vector<1x1x128xf32>
    %5 = vector.broadcast %4 : vector<1x1x128xf32> to vector<1x256x128xf32>
    %6 = arith.addf %3, %5 : vector<1x256x128xf32>
    %cst = arith.constant 0.000000e+00 : f32
    %7 = vector.broadcast %cst : f32 to vector<1x256x128xf32>
    %8 = arith.maximumf %6, %7 : vector<1x256x128xf32>
    %c0_8 = arith.constant 0 : index
    %c0_9 = arith.constant 0 : index
    %c0_10 = arith.constant 0 : index
    %9 = vector.load %arg4[%c0_8, %c0_9, %c0_10] : memref<1x256x128xf32, #tpu.memory_space<vmem>>, vector<1x256x128xf32>
    tpu.vector_store %arg4[%c0_8, %c0_9, %c0_10], %8 {strides = array<i32>} : memref<1x256x128xf32, #tpu.memory_space<vmem>>, vector<1x256x128xf32>,
    return
  }
  func.func @transform_0(%arg0: i32) -> (i32, i32, i32) {
    %c0_i32 = arith.constant 0 : i32
    %c0_i32_0 = arith.constant 0 : i32
    %c0_i32_1 = arith.constant 0 : i32
    return %arg0, %c0_i32, %c0_i32_0 : i32, i32, i32
  }
  func.func @transform_1(%arg0: i32) -> (i32, i32, i32) {
    %c0_i32 = arith.constant 0 : i32
    %c0_i32_0 = arith.constant 0 : i32
    %c0_i32_1 = arith.constant 0 : i32
    %c0_i32_2 = arith.constant 0 : i32
    return %c0_i32, %c0_i32_0, %c0_i32_1 : i32, i32, i32
  }
  func.func @transform_2(%arg0: i32) -> (i32, i32, i32) {
    %c0_i32 = arith.constant 0 : i32
    %c0_i32_0 = arith.constant 0 : i32
    %c0_i32_1 = arith.constant 0 : i32
    %c0_i32_2 = arith.constant 0 : i32
    return %c0_i32, %c0_i32_0, %c0_i32_1 : i32, i32, i32
  }
  func.func @transform_3(%arg0: i32) -> (i32, i32, i32) {
    %c0_i32 = arith.constant 0 : i32
    %c0_i32_0 = arith.constant 0 : i32
    %c0_i32_1 = arith.constant 0 : i32
    return %arg0, %c0_i32, %c0_i32_0 : i32, i32, i32
  }
}

</mosaic_0001>

<bundles_post_ra>
// kernel: block_forward.3
= control target key start
LH: loop header
LB: loop body
LE: loop exit
PB: predicated region body
PF: predicated region fallthrough
CT: control target
= control target key end

     0   :  { %s451_s12 = smov 0   ;;  %s610_s0 = inlined_call_operand.vmem [shape: f32[2,256,128], index: 0, kind: input, shape index: {}]   ;;  %s611_s1 = inlined_call_operand.vmem [shape: f32[1,1,128], index: 1, kind: input, shape index: {}]   ;;  %s612_s2 = inlined_call_operand.vmem [shape: f32[1,1,128], index: 2, kind: input, shape index: {}]   ;;  %s613_s3 = inlined_call_operand.vmem [shape: f32[2,256,128], index: 3, kind: output, shape index: {}]  }
   0x1 LB: > { %s400_s13 = sadd.s32 4294967295, %s429_s12   ;;  %p404_p0 = scmp.ge.s32.totalorder %s429_s12, 1  ;;  %s429_s12 = sphi %s451_s12, %s13_s12  }
   0x2   : > { %p137_p1 = scmp.lt.s32.totalorder %s429_s12, 3 }
   0x4   : > { %p138_p2 = pnand %p404_p0, %p137_p1 }
   0x5   : > { %p161_p3 = scmp.lt.s32.totalorder (!%p138_p2), %s400_s13, 1 }
   0x6   : > { %141 = sbr.rel (%p138_p2) target bundleno = 44 (0x2c), region = 32 }
   0xb   : > { %s615_s13 = smov (!%p161_p3, %s400_s13), 1  ;;  %v462_v0 = vld [vmem:[%s611_s1] ss:$0 sm:$0xff] }
   0xc   : > { %s413_s14 = sshll.u32 %s615_s13, 8  ;;  %v472_v1 = vld [vmem:[%s612_s2] ss:$0 sm:$0xff] }
   0xd   : > { %s467_s19 = scalar_lea.vmem %s610_s0, %s413_s14  ;;  %s495_s24 = scalar_lea.vmem %s613_s3, %s413_s14 }
   0xe   : > { %v171_v2 = vld [vmem:[%s467_s19] sm:$0xff]  ;;  %v172_v3 = vld [vmem:[%s467_s19 + $0x8] sm:$0xff]  ;;  %v173_v4 = vld [vmem:[%s467_s19 + $0x10] sm:$0xff] }
   0xf   : > { %v210_v5 = vmul.f32 %v462_v0, %v171_v2  ;;  %v211_v6 = vmul.f32 %v462_v0, %v172_v3  ;;  %v212_v7 = vmul.f32 %v462_v0, %v173_v4  ;;  %v174_v8 = vld [vmem:[%s467_s19 + $0x18] sm:$0xff]  ;;  %v175_v9 = vld [vmem:[%s467_s19 + $0x20] sm:$0xff]  ;;  %v176_v10 = vld [vmem:[%s467_s19 + $0x28] sm:$0xff] }
  0x10   : > { %v213_v11 = vmul.f32 %v462_v0, %v174_v8  ;;  %v214_v12 = vmul.f32 %v462_v0, %v175_v9  ;;  %v215_v13 = vmul.f32 %v462_v0, %v176_v10  ;;  %v177_v14 = vld [vmem:[%s467_s19 + $0x30] sm:$0xff]  ;;  %v178_v15 = vld [vmem:[%s467_s19 + $0x38] sm:$0xff]  ;;  %v179_v24 = vld [vmem:[%s467_s19 + $0x40] sm:$0xff] }
  0x11   : > { %v249_v16 = vadd.f32 %v472_v1, %v210_v5  ;;  %v250_v17 = vadd.f32 %v472_v1, %v211_v6  ;;  %v251_v18 = vadd.f32 %v472_v1, %v212_v7  ;;  %v216_v19 = vmul.f32 %v462_v0, %v177_v14  ;;  %v180_v25 = vld [vmem:[%s467_s19 + $0x48] sm:$0xff]  ;;  %v181_v26 = vld [vmem:[%s467_s19 + $0x50] sm:$0xff]  ;;  %v182_v31 = vld [vmem:[%s467_s19 + $0x58] sm:$0xff] }
  0x12   : > { %v252_v20 = vadd.f32 %v472_v1, %v213_v11  ;;  %v253_v21 = vadd.f32 %v472_v1, %v214_v12  ;;  %v254_v22 = vadd.f32 %v472_v1, %v215_v13  ;;  %v217_v23 = vmul.f32 %v462_v0, %v178_v15  ;;  %v183_v32 = vld [vmem:[%s467_s19 + $0x60] sm:$0xff]  ;;  %v184_v33 = vld [vmem:[%s467_s19 + $0x68] sm:$0xff]  ;;  %v185_v38 = vld [vmem:[%s467_s19 + $0x70] sm:$0xff] }
  0x13   : > { %v281_v27 = vmax.f32 %v249_v16, 0.0  ;;  %v282_v28 = vmax.f32 %v250_v17, 0.0  ;;  %v283_v29 = vmax.f32 %v251_v18, 0.0  ;;  %v255_v30 = vadd.f32 %v472_v1, %v216_v19  ;;  %v186_v43 = vld [vmem:[%s467_s19 + $0x78] sm:$0xff]  ;;  %v187_v56 = vld [vmem:[%s467_s19 + $0x80] sm:$0xff]  ;;  %v188_v57 = vld [vmem:[%s467_s19 + $0x88] sm:$0xff] }
  0x14   : > { %v284_v34 = vmax.f32 %v252_v20, 0.0  ;;  %v285_v35 = vmax.f32 %v253_v21, 0.0  ;;  %v286_v36 = vmax.f32 %v254_v22, 0.0  ;;  %v256_v37 = vadd.f32 %v472_v1, %v217_v23  ;;  %v189_v58 = vld [vmem:[%s467_s19 + $0x90] sm:$0xff]  ;;  %v190_v63 = vld [vmem:[%s467_s19 + $0x98] sm:$0xff]  ;;  %v191_v2 = vld [vmem:[%s467_s19 + $0xa0] sm:$0xff] }
  0x15   : > { %313 = vst [vmem:[%s495_s24] sm:$0xff] %v281_v27  ;;  %314 = vst [vmem:[%s495_s24 + $0x8] sm:$0xff] %v282_v28  ;;  %v287_v39 = vmax.f32 %v255_v30, 0.0  ;;  %v218_v40 = vmul.f32 %v462_v0, %v179_v24  ;;  %v219_v41 = vmul.f32 %v462_v0, %v180_v25  ;;  %v220_v42 = vmul.f32 %v462_v0, %v181_v26  ;;  %v192_v3 = vld [vmem:[%s467_s19 + $0xa8] sm:$0xff]  ;;  %v193_v8 = vld [vmem:[%s467_s19 + $0xb0] sm:$0xff] }
  0x16   : > { %315 = vst [vmem:[%s495_s24 + $0x10] sm:$0xff] %v283_v29  ;;  %316 = vst [vmem:[%s495_s24 + $0x18] sm:$0xff] %v284_v34  ;;  %v288_v44 = vmax.f32 %v256_v37, 0.0  ;;  %v221_v45 = vmul.f32 %v462_v0, %v182_v31  ;;  %v222_v46 = vmul.f32 %v462_v0, %v183_v32  ;;  %v223_v47 = vmul.f32 %v462_v0, %v184_v33  ;;  %v194_v13 = vld [vmem:[%s467_s19 + $0xb8] sm:$0xff]  ;;  %v195_v26 = vld [vmem:[%s467_s19 + $0xc0] sm:$0xff] }
  0x17   : > { %317 = vst [vmem:[%s495_s24 + $0x20] sm:$0xff] %v285_v35  ;;  %318 = vst [vmem:[%s495_s24 + $0x28] sm:$0xff] %v286_v36  ;;  %v257_v48 = vadd.f32 %v472_v1, %v218_v40  ;;  %v258_v49 = vadd.f32 %v472_v1, %v219_v41  ;;  %v259_v50 = vadd.f32 %v472_v1, %v220_v42  ;;  %v196_v27 = vld [vmem:[%s467_s19 + $0xc8] sm:$0xff]  ;;  %v197_v28 = vld [vmem:[%s467_s19 + $0xd0] sm:$0xff] }
  0x18   : > { %319 = vst [vmem:[%s495_s24 + $0x30] sm:$0xff] %v287_v39  ;;  %v224_v51 = vmul.f32 %v462_v0, %v185_v38  ;;  %320 = vst [vmem:[%s495_s24 + $0x38] sm:$0xff] %v288_v44  ;;  %v260_v52 = vadd.f32 %v472_v1, %v221_v45  ;;  %v261_v53 = vadd.f32 %v472_v1, %v222_v46  ;;  %v198_v33 = vld [vmem:[%s467_s19 + $0xd8] sm:$0xff]  ;;  %v199_v34 = vld [vmem:[%s467_s19 + $0xe0] sm:$0xff] }
  0x19   : > { %v262_v54 = vadd.f32 %v472_v1, %v223_v47  ;;  %v225_v55 = vmul.f32 %v462_v0, %v186_v43  ;;  %v289_v59 = vmax.f32 %v257_v48, 0.0  ;;  %v290_v60 = vmax.f32 %v258_v49, 0.0  ;;  %v200_v35 = vld [vmem:[%s467_s19 + $0xe8] sm:$0xff]  ;;  %v201_v40 = vld [vmem:[%s467_s19 + $0xf0] sm:$0xff]  ;;  %v202_v45 = vld [vmem:[%s467_s19 + $0xf8] sm:$0xff] }
  0x1a   : > { %v291_v61 = vmax.f32 %v259_v50, 0.0  ;;  %v263_v62 = vadd.f32 %v472_v1, %v224_v51  ;;  %v292_v4 = vmax.f32 %v260_v52, 0.0  ;;  %v293_v5 = vmax.f32 %v261_v53, 0.0 }
  0x1b   : > { %v294_v6 = vmax.f32 %v262_v54, 0.0  ;;  %v264_v7 = vadd.f32 %v472_v1, %v225_v55  ;;  %321 = vst [vmem:[%s495_s24 + $0x40] sm:$0xff] %v289_v59  ;;  %322 = vst [vmem:[%s495_s24 + $0x48] sm:$0xff] %v290_v60  ;;  %v226_v10 = vmul.f32 %v462_v0, %v187_v56  ;;  %v227_v11 = vmul.f32 %v462_v0, %v188_v57 }
  0x1c   : > { %323 = vst [vmem:[%s495_s24 + $0x50] sm:$0xff] %v291_v61  ;;  %v295_v9 = vmax.f32 %v263_v62, 0.0  ;;  %v228_v12 = vmul.f32 %v462_v0, %v189_v58  ;;  %324 = vst [vmem:[%s495_s24 + $0x58] sm:$0xff] %v292_v4  ;;  %v229_v15 = vmul.f32 %v462_v0, %v190_v63  ;;  %v230_v16 = vmul.f32 %v462_v0, %v191_v2 }
  0x1d   : > { %325 = vst [vmem:[%s495_s24 + $0x60] sm:$0xff] %v293_v5  ;;  %326 = vst [vmem:[%s495_s24 + $0x68] sm:$0xff] %v294_v6  ;;  %v296_v14 = vmax.f32 %v264_v7, 0.0  ;;  %v231_v17 = vmul.f32 %v462_v0, %v192_v3  ;;  %v265_v18 = vadd.f32 %v472_v1, %v226_v10  ;;  %v266_v19 = vadd.f32 %v472_v1, %v227_v11 }
  0x1e   : > { %327 = vst [vmem:[%s495_s24 + $0x70] sm:$0xff] %v295_v9  ;;  %v267_v20 = vadd.f32 %v472_v1, %v228_v12  ;;  %v232_v21 = vmul.f32 %v462_v0, %v193_v8  ;;  %v268_v22 = vadd.f32 %v472_v1, %v229_v15  ;;  %v269_v23 = vadd.f32 %v472_v1, %v230_v16 }
  0x1f   : > { %328 = vst [vmem:[%s495_s24 + $0x78] sm:$0xff] %v296_v14  ;;  %v270_v24 = vadd.f32 %v472_v1, %v231_v17  ;;  %v233_v25 = vmul.f32 %v462_v0, %v194_v13  ;;  %v297_v29 = vmax.f32 %v265_v18, 0.0  ;;  %v298_v30 = vmax.f32 %v266_v19, 0.0 }
  0x20   : > { %v299_v31 = vmax.f32 %v267_v20, 0.0  ;;  %v271_v32 = vadd.f32 %v472_v1, %v232_v21  ;;  %v300_v36 = vmax.f32 %v268_v22, 0.0  ;;  %v301_v37 = vmax.f32 %v269_v23, 0.0 }
  0x21   : > { %v302_v38 = vmax.f32 %v270_v24, 0.0  ;;  %v272_v39 = vadd.f32 %v472_v1, %v233_v25  ;;  %329 = vst [vmem:[%s495_s24 + $0x80] sm:$0xff] %v297_v29  ;;  %330 = vst [vmem:[%s495_s24 + $0x88] sm:$0xff] %v298_v30  ;;  %v234_v42 = vmul.f32 %v462_v0, %v195_v26  ;;  %v235_v43 = vmul.f32 %v462_v0, %v196_v27 }
  0x22   : > { %331 = vst [vmem:[%s495_s24 + $0x90] sm:$0xff] %v299_v31  ;;  %v303_v41 = vmax.f32 %v271_v32, 0.0  ;;  %v236_v44 = vmul.f32 %v462_v0, %v197_v28  ;;  %332 = vst [vmem:[%s495_s24 + $0x98] sm:$0xff] %v300_v36  ;;  %v237_v47 = vmul.f32 %v462_v0, %v198_v33  ;;  %v238_v48 = vmul.f32 %v462_v0, %v199_v34 }
  0x23   : > { %333 = vst [vmem:[%s495_s24 + $0xa0] sm:$0xff] %v301_v37  ;;  %334 = vst [vmem:[%s495_s24 + $0xa8] sm:$0xff] %v302_v38  ;;  %v304_v46 = vmax.f32 %v272_v39, 0.0  ;;  %v239_v49 = vmul.f32 %v462_v0, %v200_v35  ;;  %v273_v50 = vadd.f32 %v472_v1, %v234_v42  ;;  %v274_v51 = vadd.f32 %v472_v1, %v235_v43 }
  0x24   : > { %335 = vst [vmem:[%s495_s24 + $0xb0] sm:$0xff] %v303_v41  ;;  %v275_v52 = vadd.f32 %v472_v1, %v236_v44  ;;  %v240_v53 = vmul.f32 %v462_v0, %v201_v40  ;;  %v276_v54 = vadd.f32 %v472_v1, %v237_v47  ;;  %v277_v55 = vadd.f32 %v472_v1, %v238_v48 }
  0x25   : > { %336 = vst [vmem:[%s495_s24 + $0xb8] sm:$0xff] %v304_v46  ;;  %v278_v56 = vadd.f32 %v472_v1, %v239_v49  ;;  %v241_v57 = vmul.f32 %v462_v0, %v202_v45  ;;  %v305_v58 = vmax.f32 %v273_v50, 0.0  ;;  %v306_v59 = vmax.f32 %v274_v51, 0.0 }
  0x26   : > { %v307_v60 = vmax.f32 %v275_v52, 0.0  ;;  %v279_v61 = vadd.f32 %v472_v1, %v240_v53  ;;  %v308_v62 = vmax.f32 %v276_v54, 0.0  ;;  %v309_v63 = vmax.f32 %v277_v55, 0.0 }
  0x27   : > { %v310_v2 = vmax.f32 %v278_v56, 0.0  ;;  %v280_v3 = vadd.f32 %v472_v1, %v241_v57  ;;  %337 = vst [vmem:[%s495_s24 + $0xc0] sm:$0xff] %v305_v58  ;;  %338 = vst [vmem:[%s495_s24 + $0xc8] sm:$0xff] %v306_v59 }
  0x28   : > { %339 = vst [vmem:[%s495_s24 + $0xd0] sm:$0xff] %v307_v60  ;;  %v311_v4 = vmax.f32 %v279_v61, 0.0  ;;  %340 = vst [vmem:[%s495_s24 + $0xd8] sm:$0xff] %v308_v62 }
  0x29   : > { %341 = vst [vmem:[%s495_s24 + $0xe0] sm:$0xff] %v309_v63  ;;  %342 = vst [vmem:[%s495_s24 + $0xe8] sm:$0xff] %v310_v2  ;;  %v312_v0 = vmax.f32 %v280_v3, 0.0 }
  0x2a   : > { %343 = vst [vmem:[%s495_s24 + $0xf0] sm:$0xff] %v311_v4 }
  0x2b   : > { %344 = vst [vmem:[%s495_s24 + $0xf8] sm:$0xff] %v312_v0 }
  0x2c PF: > { %s13_s12 = sadd.s32 1, %s429_s12  }
  0x2d   : > { %p10_p4 = scmp.ge.s32.totalorder %s13_s12, 4  }
  0x2f   :  { %12 = sbr.rel (!%p10_p4) target bundleno = 1 (0x1), region = 62 }

// kernel: block_forward.2
= control target key start
LH: loop header
LB: loop body
LE: loop exit
PB: predicated region body
PF: predicated region fallthrough
CT: control target
= control target key end

     0   :  { %s5152_s12 = smov 0   ;;  %s6622_s0 = inlined_call_operand.vmem [shape: f32[2,18,18,4], index: 0, kind: input, shape index: {}]   ;;  %s6623_s1 = inlined_call_operand.vmem [shape: f32[9,4,128], index: 1, kind: input, shape index: {}]   ;;  %s6624_s2 = inlined_call_operand.vmem [shape: f32[2,256,128], index: 2, kind: output, shape index: {0}]   ;;  %s6625_s3 = inlined_call_operand.vmem [shape: f32[2,2,128], index: 3, kind: output, shape index: {1}]  }
   0x1 LB: > { %s3857_s13 = sadd.s32 4294967295, %s5130_s12   ;;  %p3861_p0 = scmp.ge.s32.totalorder %s5130_s12, 1  ;;  %s5130_s12 = sphi %s5152_s12, %s14_s12  }
   0x2   : > { %p140_p1 = scmp.lt.s32.totalorder %s5130_s12, 3 }
   0x4   : > { %p141_p2 = pnand %p3861_p0, %p140_p1 }
   0x6   : > { %144 = sbr.rel (%p141_p2) target bundleno = 523 (0x20b), region = 28 }
   0xb   : > { %v3866_v0 = vld [vmem:[%s6623_s1 + $0x4] sm:$0xf]  ;;  %vm346_vm0 = vcmask 1043456   ;;  %p168_p3 = scmp.lt.s32.totalorder %s3857_s13, 1  ;;  %v214_v1 = vld [vmem:[%s6623_s1] sm:$0xf] }
   0xc   : > { %5113 = vmatprep.subr.msk.mxu1 %vm346_vm0, %v3866_v0  ;;  %4663 = vmatprep.subr.msk.mxu0 %vm346_vm0, %v3866_v0  ;;  %v3933_v2 = vld [vmem:[%s6623_s1 + $0x8] sm:$0xf]  ;;  %vm249_vm1 = vcmask 31744   ;;  %v5206_v9 = vld [vmem:[%s6623_s1 + $0xc] sm:$0xf] }
   0xd   : > { %5114 = vmatpush3.msk.msra.mxu1 %vm346_vm0, %v3866_v0  ;;  %4664 = vmatpush3.msk.msra.mxu0 %vm346_vm0, %v3866_v0  ;;  %s6855_s13 = smov (!%p168_p3, %s3857_s13), 1  ;;  %v5211_v10 = vld [vmem:[%s6623_s1 + $0x10] sm:$0xf]  ;;  %v5370_v43 = vld [vmem:[%s6623_s1 + $0x14] sm:$0xf] }
   0xe   : > { %4713 = vmatprep.subr.msk.mxu1 %vm346_vm0, %v214_v1  ;;  %4763 = vmatprep.subr.msk.mxu0 %vm346_vm0, %v3933_v2  ;;  %s5115_s20 = smul.u32 432, %s6855_s13  ;;  %v5375_v44 = vld [vmem:[%s6623_s1 + $0x18] sm:$0xf]  ;;  %s4365_s9 = sshll.u32 %s6855_s13, 8 }
   0xf   : > { %s6497_s14 = scalar_lea.vmem %s6624_s2, %s4365_s9  ;;  %s3865_s15 = sshll.u32 %s6855_s13, 1 }
  0x10   : > { %s5181_s23 = scalar_lea.vmem %s6622_s0, %s5115_s20  ;;  %s181_s18 = scalar_lea.vmem %s6625_s3, %s3865_s15 }
  0x11   : > { %v215_v3 = vld [vmem:[%s5181_s23 + $0x1] sm:$0xff]  ;;  %v216_v5 = vld [vmem:[%s5181_s23 + $0x9] sm:$0xff]  ;;  %v5195_v7 = vld [vmem:[%s5181_s23 + $0x19] sm:$0xff] }
  0x12   : > { %v5185_v4 = vld [vmem:[%s5181_s23 + $0xc1] sm:$0xff]  ;;  %4665 = vmatprep.mubr.msk.f32.mxu0 %vm249_vm1, %v215_v3  ;;  %v5192_v6 = vld [vmem:[%s5181_s23 + $0xc9] sm:$0xff]  ;;  %v5198_v8 = vld [vmem:[%s5181_s23 + $0xd9] sm:$0xff] }
  0x13   : > { %4689 = vmatprep.mubr.msk.f32.mxu1 %vm249_vm1, %v5185_v4  ;;  %4666 = vmatmul.mubr.msk.f32.vlgmr.msra.gmra.mxu0 %vm249_vm1, %v216_v5  ;;  %v5216_v11 = vld [vmem:[%s5181_s23 + $0x21] sm:$0xff]  ;;  %v5226_v13 = vld [vmem:[%s5181_s23 + $0x31] sm:$0xff]  ;;  %v5244_v15 = vld [vmem:[%s5181_s23 + $0x39] sm:$0xff] }
  0x14   : > { %4690 = vmatmul.mubr.msk.f32.vlgmr.msra.gmra.mxu1 %vm249_vm1, %v5192_v6  ;;  %4764 = vmatpush3.msk.msra.mxu0 %vm346_vm0, %v3933_v2  ;;  %v5219_v12 = vld [vmem:[%s5181_s23 + $0xe1] sm:$0xff]  ;;  %v5229_v14 = vld [vmem:[%s5181_s23 + $0xf1] sm:$0xff]  ;;  %v5247_v16 = vld [vmem:[%s5181_s23 + $0xf9] sm:$0xff] }
  0x15   : > { %4714 = vmatpush3.msk.msra.mxu1 %vm346_vm0, %v214_v1  ;;  %4668 = vmatprep.mubr.msk.f32.mxu0 %vm249_vm1, %v5195_v7  ;;  %v5250_v17 = vld [vmem:[%s5181_s23 + $0x49] sm:$0xff]  ;;  %v5264_v19 = vld [vmem:[%s5181_s23 + $0x51] sm:$0xff]  ;;  %v5270_v21 = vld [vmem:[%s5181_s23 + $0x61] sm:$0xff] }
  0x16   : > { %4692 = vmatprep.mubr.msk.f32.mxu1 %vm249_vm1, %v5198_v8  ;;  %4813 = vmatprep.subr.msk.mxu1 %vm346_vm0, %v5206_v9  ;;  %v5253_v18 = vld [vmem:[%s5181_s23 + $0x109] sm:$0xff]  ;;  %v5267_v20 = vld [vmem:[%s5181_s23 + $0x111] sm:$0xff]  ;;  %v5273_v22 = vld [vmem:[%s5181_s23 + $0x121] sm:$0xff] }
  0x17   : > { %4863 = vmatprep.subr.msk.mxu0 %vm346_vm0, %v5211_v10  ;;  %4669 = vmatmul.mubr.msk.f32.gmra.mxu0 %vm249_vm1, %v5216_v11  ;;  %v5284_v23 = vld [vmem:[%s5181_s23 + $0x69] sm:$0xff]  ;;  %v5290_v25 = vld [vmem:[%s5181_s23 + $0x79] sm:$0xff]  ;;  %v5304_v27 = vld [vmem:[%s5181_s23 + $0x81] sm:$0xff] }
  0x18   : > { %4693 = vmatmul.mubr.msk.f32.gmra.mxu1 %vm249_vm1, %v5219_v12  ;;  %4671 = vmatprep.mubr.msk.f32.mxu0 %vm249_vm1, %v5226_v13  ;;  %v5287_v24 = vld [vmem:[%s5181_s23 + $0x129] sm:$0xff]  ;;  %v5293_v26 = vld [vmem:[%s5181_s23 + $0x139] sm:$0xff]  ;;  %v5307_v28 = vld [vmem:[%s5181_s23 + $0x141] sm:$0xff] }
  0x19   : > { %4695 = vmatprep.mubr.msk.f32.mxu1 %vm249_vm1, %v5229_v14  ;;  %v5310_v29 = vld [vmem:[%s5181_s23 + $0x91] sm:$0xff]  ;;  %v5324_v31 = vld [vmem:[%s5181_s23 + $0x99] sm:$0xff]  ;;  %v5330_v33 = vld [vmem:[%s5181_s23 + $0xa9] sm:$0xff] }
  0x1a   : > { %v5313_v30 = vld [vmem:[%s5181_s23 + $0x151] sm:$0xff]  ;;  %v5327_v32 = vld [vmem:[%s5181_s23 + $0x159] sm:$0xff]  ;;  %v5333_v34 = vld [vmem:[%s5181_s23 + $0x169] sm:$0xff] }
  0x1b   : > { %4672 = vmatmul.mubr.msk.f32.gmra.mxu0 %vm249_vm1, %v5244_v15  ;;  %v5344_v35 = vld [vmem:[%s5181_s23 + $0xb1] sm:$0xff]  ;;  %v182_v37 = vld [vmem:[%s5181_s23] sm:$0xff]  ;;  %v183_v39 = vld [vmem:[%s5181_s23 + $0x8] sm:$0xff] }
  0x1c   : > { %4696 = vmatmul.mubr.msk.f32.gmra.mxu1 %vm249_vm1, %v5247_v16  ;;  %4674 = vmatprep.mubr.msk.f32.mxu0 %vm249_vm1, %v5250_v17  ;;  %v5347_v36 = vld [vmem:[%s5181_s23 + $0x171] sm:$0xff]  ;;  %v899_v38 = vld [vmem:[%s5181_s23 + $0x2] sm:$0xff]  ;;  %v5363_v42 = vld [vmem:[%s5181_s23 + $0x1a] sm:$0xff] }
  0x1d   : > { %4698 = vmatprep.mubr.msk.f32.mxu1 %vm249_vm1, %v5253_v18  ;;  %6686 = vst [vmem:[#allocation2_spill] sm:$0xff] %v5347_v36  ;;  %v900_v40 = vld [vmem:[%s5181_s23 + $0xa] sm:$0xff]  ;;  %v5360_v41 = vld [vmem:[%s5181_s23 + $0x18] sm:$0xff]  ;;  %6687 = vst [vmem:[#allocation3_spill] sm:$0xff] %v5363_v42 }
  0x1e   : > { %v5382_v45 = vld [vmem:[%s5181_s23 + $0x20] sm:$0xff]  ;;  %v5392_v47 = vld [vmem:[%s5181_s23 + $0x30] sm:$0xff]  ;;  %v5410_v49 = vld [vmem:[%s5181_s23 + $0x38] sm:$0xff] }
  0x1f   : > { %4675 = vmatmul.mubr.msk.f32.gmra.mxu0 %vm249_vm1, %v5264_v19  ;;  %v5385_v46 = vld [vmem:[%s5181_s23 + $0x22] sm:$0xff]  ;;  %v5395_v48 = vld [vmem:[%s5181_s23 + $0x32] sm:$0xff]  ;;  %v5413_v50 = vld [vmem:[%s5181_s23 + $0x3a] sm:$0xff] }
  0x20   : > { %4699 = vmatmul.mubr.msk.f32.gmra.mxu1 %vm249_vm1, %v5267_v20  ;;  %4677 = vmatprep.mubr.msk.f32.mxu0 %vm249_vm1, %v5270_v21  ;;  %6688 = vst [vmem:[#allocation4_spill] sm:$0xff] %v5385_v46  ;;  %6689 = vst [vmem:[#allocation5_spill] sm:$0xff] %v5395_v48  ;;  %v5416_v51 = vld [vmem:[%s5181_s23 + $0x48] sm:$0xff]  ;;  %v5430_v53 = vld [vmem:[%s5181_s23 + $0x50] sm:$0xff] }
  0x21   : > { %4701 = vmatprep.mubr.msk.f32.mxu1 %vm249_vm1, %v5273_v22  ;;  %6690 = vst [vmem:[#allocation6_spill] sm:$0xff] %v5413_v50  ;;  %v5419_v52 = vld [vmem:[%s5181_s23 + $0x4a] sm:$0xff]  ;;  %v5433_v54 = vld [vmem:[%s5181_s23 + $0x52] sm:$0xff]  ;;  %v5436_v55 = vld [vmem:[%s5181_s23 + $0x60] sm:$0xff] }
  0x22   : > { %6691 = vst [vmem:[#allocation7_spill] sm:$0xff] %v5419_v52  ;;  %6692 = vst [vmem:[#allocation8_spill] sm:$0xff] %v5433_v54  ;;  %v5439_v56 = vld [vmem:[%s5181_s23 + $0x62] sm:$0xff]  ;;  %v5453_v58 = vld [vmem:[%s5181_s23 + $0x6a] sm:$0xff] }
  0x23   : > { %4678 = vmatmul.mubr.msk.f32.gmra.mxu0 %vm249_vm1, %v5284_v23  ;;  %6693 = vst [vmem:[#allocation9_spill] sm:$0xff] %v5439_v56  ;;  %v5450_v57 = vld [vmem:[%s5181_s23 + $0x68] sm:$0xff]  ;;  %6694 = vst [vmem:[#allocation10_spill] sm:$0xff] %v5453_v58  ;;  %v5456_v59 = vld [vmem:[%s5181_s23 + $0x78] sm:$0xff] }
  0x24   : > { %4702 = vmatmul.mubr.msk.f32.gmra.mxu1 %vm249_vm1, %v5287_v24  ;;  %4680 = vmatprep.mubr.msk.f32.mxu0 %vm249_vm1, %v5290_v25  ;;  %v5459_v60 = vld [vmem:[%s5181_s23 + $0x7a] sm:$0xff]  ;;  %v5473_v62 = vld [vmem:[%s5181_s23 + $0x82] sm:$0xff]  ;;  %v5476_v63 = vld [vmem:[%s5181_s23 + $0x90] sm:$0xff] }
  0x25   : > { %4704 = vmatprep.mubr.msk.f32.mxu1 %vm249_vm1, %v5293_v26  ;;  %6695 = vst [vmem:[#allocation11_spill] sm:$0xff] %v5459_v60  ;;  %v5470_v61 = vld [vmem:[%s5181_s23 + $0x80] sm:$0xff]  ;;  %6696 = vst [vmem:[#allocation12_spill] sm:$0xff] %v5473_v62  ;;  %v5479_v0 = vld [vmem:[%s5181_s23 + $0x92] sm:$0xff] }
  0x26   : > { %6697 = vst [vmem:[#allocation13_spill] sm:$0xff] %v5479_v0  ;;  %v5490_v1 = vld [vmem:[%s5181_s23 + $0x98] sm:$0xff]  ;;  %v5496_v3 = vld [vmem:[%s5181_s23 + $0xa8] sm:$0xff] }
  0x27   : > { %4681 = vmatmul.mubr.msk.f32.gmra.mxu0 %vm249_vm1, %v5304_v27  ;;  %v5493_v2 = vld [vmem:[%s5181_s23 + $0x9a] sm:$0xff]  ;;  %v5499_v5 = vld [vmem:[%s5181_s23 + $0xaa] sm:$0xff] }
  0x28   : > { %4705 = vmatmul.mubr.msk.f32.gmra.mxu1 %vm249_vm1, %v5307_v28  ;;  %4683 = vmatprep.mubr.msk.f32.mxu0 %vm249_vm1, %v5310_v29  ;;  %6698 = vst [vmem:[#allocation14_spill] sm:$0xff] %v5493_v2  ;;  %6699 = vst [vmem:[#allocation15_spill] sm:$0xff] %v5499_v5 }
  0x29   : > { %4707 = vmatprep.mubr.msk.f32.mxu1 %vm249_vm1, %v5313_v30 }
  0x2b   : > { %4684 = vmatmul.mubr.msk.f32.gmra.mxu0 %vm249_vm1, %v5324_v31 }
  0x2c   : > { %4708 = vmatmul.mubr.msk.f32.gmra.mxu1 %vm249_vm1, %v5327_v32  ;;  %4686 = vmatprep.mubr.msk.f32.mxu0 %vm249_vm1, %v5330_v33 }
  0x2d   : > { %4710 = vmatprep.mubr.msk.f32.mxu1 %vm249_vm1, %v5333_v34 }
  0x2f   : > { %4687 = vmatmul.mubr.msk.f32.gmra.mxu0 %vm249_vm1, %v5344_v35 }
  0x30   : > { %4711 = vmatmul.mubr.msk.f32.gmra.mxu1 %vm249_vm1, %v5347_v36  ;;  %4765 = vmatprep.mubr.msk.f32.mxu0 %vm249_vm1, %v899_v38  ;;  %v5519_v38 = vld [vmem:[%s5181_s23 + $0xc2] sm:$0xff]  ;;  %v5659_v36 = vld [vmem:[%s5181_s23 + $0x16a] sm:$0xff] }
  0x31   : > { %4715 = vmatprep.mubr.msk.f32.mxu1 %vm249_vm1, %v182_v37  ;;  %v5516_v37 = vld [vmem:[%s5181_s23 + $0xc0] sm:$0xff]  ;;  %6701 = vst [vmem:[#allocation17_spill] sm:$0xff] %v5519_v38  ;;  %6715 = vst [vmem:[#allocation31_spill] sm:$0xff] %v5659_v36 }
  0x33   : > { %4766 = vmatmul.mubr.msk.f32.vlgmr.msra.gmra.mxu0 %vm249_vm1, %v900_v40  ;;  %v5533_v40 = vld [vmem:[%s5181_s23 + $0xca] sm:$0xff] }
  0x34   : > { %4716 = vmatmul.mubr.msk.f32.vlgmr.msra.gmra.mxu1 %vm249_vm1, %v183_v39  ;;  %4864 = vmatpush3.msk.msra.mxu0 %vm346_vm0, %v5211_v10  ;;  %v5513_v10 = vld [vmem:[%s5181_s23 + $0xb2] sm:$0xff]  ;;  %v5530_v39 = vld [vmem:[%s5181_s23 + $0xc8] sm:$0xff]  ;;  %6702 = vst [vmem:[#allocation18_spill] sm:$0xff] %v5533_v40 }
  0x35   : > { %4814 = vmatpush3.msk.msra.mxu1 %vm346_vm0, %v5206_v9  ;;  %4718 = vmatprep.mubr.msk.f32.mxu1 %vm249_vm1, %v5360_v41  ;;  %v5510_v9 = vld [vmem:[%s5181_s23 + $0xb0] sm:$0xff]  ;;  %6700 = vst [vmem:[#allocation16_spill] sm:$0xff] %v5513_v10 }
  0x36   : > { %4768 = vmatprep.mubr.msk.f32.mxu0 %vm249_vm1, %v5363_v42  ;;  %4913 = vmatprep.subr.msk.mxu1 %vm346_vm0, %v5370_v43  ;;  %v5656_v42 = vld [vmem:[%s5181_s23 + $0x168] sm:$0xff] }
  0x37   : > { %4963 = vmatprep.subr.msk.mxu0 %vm346_vm0, %v5375_v44  ;;  %4769 = vmatmul.mubr.msk.f32.gmra.mxu0 %vm249_vm1, %v5385_v46  ;;  %v5639_v46 = vld [vmem:[%s5181_s23 + $0x152] sm:$0xff] }
  0x38   : > { %4719 = vmatmul.mubr.msk.f32.gmra.mxu1 %vm249_vm1, %v5382_v45  ;;  %4771 = vmatprep.mubr.msk.f32.mxu0 %vm249_vm1, %v5395_v48  ;;  %v5636_v48 = vld [vmem:[%s5181_s23 + $0x150] sm:$0xff]  ;;  %6713 = vst [vmem:[#allocation29_spill] sm:$0xff] %v5639_v46 }
  0x39   : > { %4721 = vmatprep.mubr.msk.f32.mxu1 %vm249_vm1, %v5392_v47 }
  0x3b   : > { %4772 = vmatmul.mubr.msk.f32.gmra.mxu0 %vm249_vm1, %v5413_v50  ;;  %v5619_v50 = vld [vmem:[%s5181_s23 + $0x13a] sm:$0xff] }
  0x3c   : > { %4722 = vmatmul.mubr.msk.f32.gmra.mxu1 %vm249_vm1, %v5410_v49  ;;  %4774 = vmatprep.mubr.msk.f32.mxu0 %vm249_vm1, %v5419_v52  ;;  %v5616_v52 = vld [vmem:[%s5181_s23 + $0x138] sm:$0xff]  ;;  %6711 = vst [vmem:[#allocation27_spill] sm:$0xff] %v5619_v50 }
  0x3d   : > { %4724 = vmatprep.mubr.msk.f32.mxu1 %vm249_vm1, %v5416_v51 }
  0x3f   : > { %4775 = vmatmul.mubr.msk.f32.gmra.mxu0 %vm249_vm1, %v5433_v54  ;;  %v5599_v54 = vld [vmem:[%s5181_s23 + $0x122] sm:$0xff] }
  0x40   : > { %4725 = vmatmul.mubr.msk.f32.gmra.mxu1 %vm249_vm1, %v5430_v53  ;;  %4777 = vmatprep.mubr.msk.f32.mxu0 %vm249_vm1, %v5439_v56  ;;  %v5596_v56 = vld [vmem:[%s5181_s23 + $0x120] sm:$0xff]  ;;  %6709 = vst [vmem:[#allocation25_spill] sm:$0xff] %v5599_v54 }
  0x41   : > { %4727 = vmatprep.mubr.msk.f32.mxu1 %vm249_vm1, %v5436_v55 }
  0x43   : > { %4778 = vmatmul.mubr.msk.f32.gmra.mxu0 %vm249_vm1, %v5453_v58  ;;  %v5579_v58 = vld [vmem:[%s5181_s23 + $0x10a] sm:$0xff] }
  0x44   : > { %4728 = vmatmul.mubr.msk.f32.gmra.mxu1 %vm249_vm1, %v5450_v57  ;;  %4780 = vmatprep.mubr.msk.f32.mxu0 %vm249_vm1, %v5459_v60  ;;  %v5576_v60 = vld [vmem:[%s5181_s23 + $0x108] sm:$0xff]  ;;  %6707 = vst [vmem:[#allocation23_spill] sm:$0xff] %v5579_v58 }
  0x45   : > { %4730 = vmatprep.mubr.msk.f32.mxu1 %vm249_vm1, %v5456_v59 }
  0x47   : > { %4781 = vmatmul.mubr.msk.f32.gmra.mxu0 %vm249_vm1, %v5473_v62  ;;  %v5559_v62 = vld [vmem:[%s5181_s23 + $0xf2] sm:$0xff] }
  0x48   : > { %4731 = vmatmul.mubr.msk.f32.gmra.mxu1 %vm249_vm1, %v5470_v61  ;;  %4783 = vmatprep.mubr.msk.f32.mxu0 %vm249_vm1, %v5479_v0  ;;  %v5556_v0 = vld [vmem:[%s5181_s23 + $0xf0] sm:$0xff]  ;;  %6705 = vst [vmem:[#allocation21_spill] sm:$0xff] %v5559_v62 }
  0x49   : > { %4733 = vmatprep.mubr.msk.f32.mxu1 %vm249_vm1, %v5476_v63 }
  0x4b   : > { %4784 = vmatmul.mubr.msk.f32.gmra.mxu0 %vm249_vm1, %v5493_v2  ;;  %v5539_v2 = vld [vmem:[%s5181_s23 + $0xda] sm:$0xff] }
  0x4c   : > { %4734 = vmatmul.mubr.msk.f32.gmra.mxu1 %vm249_vm1, %v5490_v1  ;;  %4786 = vmatprep.mubr.msk.f32.mxu0 %vm249_vm1, %v5499_v5  ;;  %v5536_v5 = vld [vmem:[%s5181_s23 + $0xd8] sm:$0xff]  ;;  %6703 = vst [vmem:[#allocation19_spill] sm:$0xff] %v5539_v2 }
  0x4d   : > { %4736 = vmatprep.mubr.msk.f32.mxu1 %vm249_vm1, %v5496_v3 }
  0x4f   : > { %4787 = vmatmul.mubr.msk.f32.gmra.mxu0 %vm249_vm1, %v5513_v10  ;;  %v5553_v10 = vld [vmem:[%s5181_s23 + $0xe2] sm:$0xff] }
  0x50   : > { %4737 = vmatmul.mubr.msk.f32.gmra.mxu1 %vm249_vm1, %v5510_v9  ;;  %4789 = vmatprep.mubr.msk.f32.mxu0 %vm249_vm1, %v5519_v38  ;;  %v5550_v38 = vld [vmem:[%s5181_s23 + $0xe0] sm:$0xff]  ;;  %6704 = vst [vmem:[#allocation20_spill] sm:$0xff] %v5553_v10 }
  0x51   : > { %4739 = vmatprep.mubr.msk.f32.mxu1 %vm249_vm1, %v5516_v37 }
  0x53   : > { %4790 = vmatmul.mubr.msk.f32.gmra.mxu0 %vm249_vm1, %v5533_v40  ;;  %v5573_v40 = vld [vmem:[%s5181_s23 + $0xfa] sm:$0xff] }
  0x54   : > { %4740 = vmatmul.mubr.msk.f32.gmra.mxu1 %vm249_vm1, %v5530_v39  ;;  %4792 = vmatprep.mubr.msk.f32.mxu0 %vm249_vm1, %v5539_v2  ;;  %v5570_v2 = vld [vmem:[%s5181_s23 + $0xf8] sm:$0xff]  ;;  %6706 = vst [vmem:[#allocation22_spill] sm:$0xff] %v5573_v40 }
  0x55   : > { %4742 = vmatprep.mubr.msk.f32.mxu1 %vm249_vm1, %v5536_v5 }
  0x57   : > { %4793 = vmatmul.mubr.msk.f32.gmra.mxu0 %vm249_vm1, %v5553_v10  ;;  %v5593_v10 = vld [vmem:[%s5181_s23 + $0x112] sm:$0xff] }
  0x58   : > { %4743 = vmatmul.mubr.msk.f32.gmra.mxu1 %vm249_vm1, %v5550_v38  ;;  %4795 = vmatprep.mubr.msk.f32.mxu0 %vm249_vm1, %v5559_v62  ;;  %v5590_v62 = vld [vmem:[%s5181_s23 + $0x110] sm:$0xff]  ;;  %6708 = vst [vmem:[#allocation24_spill] sm:$0xff] %v5593_v10 }
  0x59   : > { %4745 = vmatprep.mubr.msk.f32.mxu1 %vm249_vm1, %v5556_v0 }
  0x5b   : > { %4796 = vmatmul.mubr.msk.f32.gmra.mxu0 %vm249_vm1, %v5573_v40  ;;  %v5613_v40 = vld [vmem:[%s5181_s23 + $0x12a] sm:$0xff] }
  0x5c   : > { %4746 = vmatmul.mubr.msk.f32.gmra.mxu1 %vm249_vm1, %v5570_v2  ;;  %4798 = vmatprep.mubr.msk.f32.mxu0 %vm249_vm1, %v5579_v58  ;;  %v5610_v58 = vld [vmem:[%s5181_s23 + $0x128] sm:$0xff]  ;;  %6710 = vst [vmem:[#allocation26_spill] sm:$0xff] %v5613_v40 }
  0x5d   : > { %4748 = vmatprep.mubr.msk.f32.mxu1 %vm249_vm1, %v5576_v60 }
  0x5f   : > { %4799 = vmatmul.mubr.msk.f32.gmra.mxu0 %vm249_vm1, %v5593_v10  ;;  %v5633_v10 = vld [vmem:[%s5181_s23 + $0x142] sm:$0xff] }
  0x60   : > { %4749 = vmatmul.mubr.msk.f32.gmra.mxu1 %vm249_vm1, %v5590_v62  ;;  %4801 = vmatprep.mubr.msk.f32.mxu0 %vm249_vm1, %v5599_v54  ;;  %v5630_v54 = vld [vmem:[%s5181_s23 + $0x140] sm:$0xff]  ;;  %6712 = vst [vmem:[#allocation28_spill] sm:$0xff] %v5633_v10 }
  0x61   : > { %4751 = vmatprep.mubr.msk.f32.mxu1 %vm249_vm1, %v5596_v56 }
  0x63   : > { %4802 = vmatmul.mubr.msk.f32.gmra.mxu0 %vm249_vm1, %v5613_v40  ;;  %v5653_v40 = vld [vmem:[%s5181_s23 + $0x15a] sm:$0xff] }
  0x64   : > { %4752 = vmatmul.mubr.msk.f32.gmra.mxu1 %vm249_vm1, %v5610_v58  ;;  %4804 = vmatprep.mubr.msk.f32.mxu0 %vm249_vm1, %v5619_v50  ;;  %v5650_v50 = vld [vmem:[%s5181_s23 + $0x158] sm:$0xff]  ;;  %6714 = vst [vmem:[#allocation30_spill] sm:$0xff] %v5653_v40 }
  0x65   : > { %4754 = vmatprep.mubr.msk.f32.mxu1 %vm249_vm1, %v5616_v52 }
  0x67   : > { %4805 = vmatmul.mubr.msk.f32.gmra.mxu0 %vm249_vm1, %v5633_v10  ;;  %v5673_v10 = vld [vmem:[%s5181_s23 + $0x172] sm:$0xff] }
  0x68   : > { %4755 = vmatmul.mubr.msk.f32.gmra.mxu1 %vm249_vm1, %v5630_v54  ;;  %4807 = vmatprep.mubr.msk.f32.mxu0 %vm249_vm1, %v5639_v46  ;;  %v5670_v46 = vld [vmem:[%s5181_s23 + $0x170] sm:$0xff]  ;;  %6716 = vst [vmem:[#allocation32_spill] sm:$0xff] %v5673_v10 }
  0x69   : > { %4757 = vmatprep.mubr.msk.f32.mxu1 %vm249_vm1, %v5636_v48 }
  0x6b   : > { %4808 = vmatmul.mubr.msk.f32.gmra.mxu0 %vm249_vm1, %v5653_v40 }
  0x6c   : > { %4758 = vmatmul.mubr.msk.f32.gmra.mxu1 %vm249_vm1, %v5650_v50  ;;  %4810 = vmatprep.mubr.msk.f32.mxu0 %vm249_vm1, %v5659_v36  ;;  %v5690_v36 = vld [vmem:[%s6623_s1 + $0x1c] sm:$0xf] }
  0x6d   : > { %4760 = vmatprep.mubr.msk.f32.mxu1 %vm249_vm1, %v5656_v42 }
  0x6f   : > { %4811 = vmatmul.mubr.msk.f32.gmra.mxu0 %vm249_vm1, %v5673_v10  ;;  %v5695_v10 = vld [vmem:[%s6623_s1 + $0x20] sm:$0xf] }
  0x70   : > { %4761 = vmatmul.mubr.msk.f32.gmra.mxu1 %vm249_vm1, %v5670_v46  ;;  %4865 = vmatprep.mubr.msk.f32.mxu0 %vm249_vm1, %v5195_v7  ;;  %v6718_v7 = vld [vmem:[#allocation2_spill] sm:$0xff] }
  0x71   : > { %4815 = vmatprep.mubr.msk.f32.mxu1 %vm249_vm1, %v5360_v41 }
  0x73   : > { %4866 = vmatmul.mubr.msk.f32.vlgmr.msra.gmra.mxu0 %vm249_vm1, %v5216_v11  ;;  %v5831_v11 = vld [vmem:[%s5181_s23 + $0x189] sm:$0xff] }
  0x74   : > { %4816 = vmatmul.mubr.msk.f32.vlgmr.msra.gmra.mxu1 %vm249_vm1, %v5382_v45  ;;  %4964 = vmatpush3.msk.msra.mxu0 %vm346_vm0, %v5375_v44  ;;  %6719 = vst [vmem:[#allocation2_spill] sm:$0xff] %v5831_v11  ;;  %v6737_v44 = vld [vmem:[#allocation20_spill] sm:$0xff]  ;;  %v6738_v45 = vld [vmem:[#allocation21_spill] sm:$0xff] }
  0x75   : > { %4914 = vmatpush3.msk.msra.mxu1 %vm346_vm0, %v5370_v43  ;;  %4818 = vmatprep.mubr.msk.f32.mxu1 %vm249_vm1, %v5392_v47 }
  0x76   : > { %4868 = vmatprep.mubr.msk.f32.mxu0 %vm249_vm1, %v5226_v13  ;;  %5013 = vmatprep.subr.msk.mxu1 %vm346_vm0, %v5690_v36 }
  0x77   : > { %5063 = vmatprep.subr.msk.mxu0 %vm346_vm0, %v5695_v10  ;;  %4869 = vmatmul.mubr.msk.f32.gmra.mxu0 %vm249_vm1, %v5244_v15 }
  0x78   : > { %4819 = vmatmul.mubr.msk.f32.gmra.mxu1 %vm249_vm1, %v5410_v49  ;;  %4871 = vmatprep.mubr.msk.f32.mxu0 %vm249_vm1, %v5250_v17 }
  0x79   : > { %4821 = vmatprep.mubr.msk.f32.mxu1 %vm249_vm1, %v5416_v51 }
  0x7b   : > { %4872 = vmatmul.mubr.msk.f32.gmra.mxu0 %vm249_vm1, %v5264_v19 }
  0x7c   : > { %4822 = vmatmul.mubr.msk.f32.gmra.mxu1 %vm249_vm1, %v5430_v53  ;;  %4874 = vmatprep.mubr.msk.f32.mxu0 %vm249_vm1, %v5270_v21 }
  0x7d   : > { %4824 = vmatprep.mubr.msk.f32.mxu1 %vm249_vm1, %v5436_v55 }
  0x7f   : > { %4875 = vmatmul.mubr.msk.f32.gmra.mxu0 %vm249_vm1, %v5284_v23 }
  0x80   : > { %4825 = vmatmul.mubr.msk.f32.gmra.mxu1 %vm249_vm1, %v5450_v57  ;;  %4877 = vmatprep.mubr.msk.f32.mxu0 %vm249_vm1, %v5290_v25 }
  0x81   : > { %4827 = vmatprep.mubr.msk.f32.mxu1 %vm249_vm1, %v5456_v59 }
  0x83   : > { %4878 = vmatmul.mubr.msk.f32.gmra.mxu0 %vm249_vm1, %v5304_v27 }
  0x84   : > { %4828 = vmatmul.mubr.msk.f32.gmra.mxu1 %vm249_vm1, %v5470_v61  ;;  %4880 = vmatprep.mubr.msk.f32.mxu0 %vm249_vm1, %v5310_v29  ;;  %v6729_v29 = vld [vmem:[#allocation12_spill] sm:$0xff] }
  0x85   : > { %4830 = vmatprep.mubr.msk.f32.mxu1 %vm249_vm1, %v5476_v63 }
  0x87   : > { %4881 = vmatmul.mubr.msk.f32.gmra.mxu0 %vm249_vm1, %v5324_v31  ;;  %v6731_v31 = vld [vmem:[#allocation14_spill] sm:$0xff] }
  0x88   : > { %4831 = vmatmul.mubr.msk.f32.gmra.mxu1 %vm249_vm1, %v5490_v1  ;;  %4883 = vmatprep.mubr.msk.f32.mxu0 %vm249_vm1, %v5330_v33  ;;  %v6733_v33 = vld [vmem:[#allocation16_spill] sm:$0xff] }
  0x89   : > { %4833 = vmatprep.mubr.msk.f32.mxu1 %vm249_vm1, %v5496_v3 }
  0x8b   : > { %4884 = vmatmul.mubr.msk.f32.gmra.mxu0 %vm249_vm1, %v5344_v35  ;;  %v6735_v35 = vld [vmem:[#allocation18_spill] sm:$0xff] }
  0x8c   : > { %4834 = vmatmul.mubr.msk.f32.gmra.mxu1 %vm249_vm1, %v5510_v9  ;;  %4886 = vmatprep.mubr.msk.f32.mxu0 %vm249_vm1, %v5185_v4  ;;  %v5814_v4 = vld [vmem:[%s5181_s23 + $0x180] sm:$0xff] }
  0x8d   : > { %4836 = vmatprep.mubr.msk.f32.mxu1 %vm249_vm1, %v5516_v37 }
  0x8f   : > { %4887 = vmatmul.mubr.msk.f32.gmra.mxu0 %vm249_vm1, %v5192_v6  ;;  %v5817_v6 = vld [vmem:[%s5181_s23 + $0x181] sm:$0xff] }
  0x90   : > { %4837 = vmatmul.mubr.msk.f32.gmra.mxu1 %vm249_vm1, %v5530_v39  ;;  %4889 = vmatprep.mubr.msk.f32.mxu0 %vm249_vm1, %v5198_v8  ;;  %6717 = vst [vmem:[#allocation33_spill] sm:$0xff] %v5817_v6  ;;  %v5828_v8 = vld [vmem:[%s5181_s23 + $0x188] sm:$0xff] }
  0x91   : > { %4839 = vmatprep.mubr.msk.f32.mxu1 %vm249_vm1, %v5536_v5 }
  0x93   : > { %4890 = vmatmul.mubr.msk.f32.gmra.mxu0 %vm249_vm1, %v5219_v12  ;;  %v6720_v12 = vld [vmem:[#allocation3_spill] sm:$0xff] }
  0x94   : > { %4840 = vmatmul.mubr.msk.f32.gmra.mxu1 %vm249_vm1, %v5550_v38  ;;  %4892 = vmatprep.mubr.msk.f32.mxu0 %vm249_vm1, %v5229_v14  ;;  %v6721_v14 = vld [vmem:[#allocation4_spill] sm:$0xff] }
  0x95   : > { %4842 = vmatprep.mubr.msk.f32.mxu1 %vm249_vm1, %v5556_v0 }
  0x97   : > { %4893 = vmatmul.mubr.msk.f32.gmra.mxu0 %vm249_vm1, %v5247_v16  ;;  %v6722_v16 = vld [vmem:[#allocation5_spill] sm:$0xff] }
  0x98   : > { %4843 = vmatmul.mubr.msk.f32.gmra.mxu1 %vm249_vm1, %v5570_v2  ;;  %4895 = vmatprep.mubr.msk.f32.mxu0 %vm249_vm1, %v5253_v18  ;;  %v6723_v18 = vld [vmem:[#allocation6_spill] sm:$0xff] }
  0x99   : > { %4845 = vmatprep.mubr.msk.f32.mxu1 %vm249_vm1, %v5576_v60 }
  0x9b   : > { %4896 = vmatmul.mubr.msk.f32.gmra.mxu0 %vm249_vm1, %v5267_v20  ;;  %v6724_v20 = vld [vmem:[#allocation7_spill] sm:$0xff] }
  0x9c   : > { %4846 = vmatmul.mubr.msk.f32.gmra.mxu1 %vm249_vm1, %v5590_v62  ;;  %4898 = vmatprep.mubr.msk.f32.mxu0 %vm249_vm1, %v5273_v22  ;;  %v6725_v22 = vld [vmem:[#allocation8_spill] sm:$0xff] }
  0x9d   : > { %4848 = vmatprep.mubr.msk.f32.mxu1 %vm249_vm1, %v5596_v56 }
  0x9f   : > { %4899 = vmatmul.mubr.msk.f32.gmra.mxu0 %vm249_vm1, %v5287_v24  ;;  %v6726_v24 = vld [vmem:[#allocation9_spill] sm:$0xff] }
  0xa0   : > { %4849 = vmatmul.mubr.msk.f32.gmra.mxu1 %vm249_vm1, %v5610_v58  ;;  %4901 = vmatprep.mubr.msk.f32.mxu0 %vm249_vm1, %v5293_v26  ;;  %v6727_v26 = vld [vmem:[#allocation10_spill] sm:$0xff] }
  0xa1   : > { %4851 = vmatprep.mubr.msk.f32.mxu1 %vm249_vm1, %v5616_v52 }
  0xa3   : > { %4902 = vmatmul.mubr.msk.f32.gmra.mxu0 %vm249_vm1, %v5307_v28  ;;  %v6728_v28 = vld [vmem:[#allocation11_spill] sm:$0xff] }
  0xa4   : > { %4852 = vmatmul.mubr.msk.f32.gmra.mxu1 %vm249_vm1, %v5630_v54  ;;  %4904 = vmatprep.mubr.msk.f32.mxu0 %vm249_vm1, %v5313_v30  ;;  %v6730_v30 = vld [vmem:[#allocation13_spill] sm:$0xff] }
  0xa5   : > { %4854 = vmatprep.mubr.msk.f32.mxu1 %vm249_vm1, %v5636_v48 }
  0xa7   : > { %4905 = vmatmul.mubr.msk.f32.gmra.mxu0 %vm249_vm1, %v5327_v32  ;;  %v6732_v32 = vld [vmem:[#allocation15_spill] sm:$0xff] }
  0xa8   : > { %4855 = vmatmul.mubr.msk.f32.gmra.mxu1 %vm249_vm1, %v5650_v50  ;;  %4907 = vmatprep.mubr.msk.f32.mxu0 %vm249_vm1, %v5333_v34  ;;  %v6734_v34 = vld [vmem:[#allocation17_spill] sm:$0xff] }
  0xa9   : > { %4857 = vmatprep.mubr.msk.f32.mxu1 %vm249_vm1, %v5656_v42 }
  0xab   : > { %4908 = vmatmul.mubr.msk.f32.gmra.mxu0 %vm249_vm1, %v6718_v7 }
  0xac   : > { %4858 = vmatmul.mubr.msk.f32.gmra.mxu1 %vm249_vm1, %v5670_v46  ;;  %4910 = vmatprep.mubr.msk.f32.mxu0 %vm249_vm1, %v5817_v6  ;;  %v4195_v6 = vld [vmem:[%s5181_s23 + $0x198] sm:$0xff] }
  0xad   : > { %4860 = vmatprep.mubr.msk.f32.mxu1 %vm249_vm1, %v5814_v4 }
  0xaf   : > { %4911 = vmatmul.mubr.msk.f32.gmra.mxu0 %vm249_vm1, %v5831_v11  ;;  %v6006_v11 = vld [vmem:[%s5181_s23 + $0x182] sm:$0xff] }
  0xb0   : > { %4861 = vmatmul.mubr.msk.f32.gmra.mxu1 %vm249_vm1, %v5828_v8  ;;  %4965 = vmatprep.mubr.msk.f32.mxu0 %vm249_vm1, %v5392_v47  ;;  %6752 = vst [vmem:[#allocation7_spill] sm:$0xff] %v6006_v11 }
  0xb1   : > { %4915 = vmatprep.mubr.msk.f32.mxu1 %vm249_vm1, %v6720_v12 }
  0xb3   : > { %4966 = vmatmul.mubr.msk.f32.vlgmr.msra.gmra.mxu0 %vm249_vm1, %v5410_v49 }
  0xb4   : > { %4916 = vmatmul.mubr.msk.f32.vlgmr.msra.gmra.mxu1 %vm249_vm1, %v6721_v14  ;;  %5064 = vmatpush3.msk.msra.mxu0 %vm346_vm0, %v5695_v10 }
  0xb5   : > { %5014 = vmatpush3.msk.msra.mxu1 %vm346_vm0, %v5690_v36  ;;  %4918 = vmatprep.mubr.msk.f32.mxu1 %vm249_vm1, %v6722_v16  ;;  %v6736_v36 = vld [vmem:[#allocation19_spill] sm:$0xff] }
  0xb6   : > { %4968 = vmatprep.mubr.msk.f32.mxu0 %vm249_vm1, %v5416_v51 }
  0xb7   : > { %4969 = vmatmul.mubr.msk.f32.gmra.mxu0 %vm249_vm1, %v5430_v53 }
  0xb8   : > { %4919 = vmatmul.mubr.msk.f32.gmra.mxu1 %vm249_vm1, %v6723_v18  ;;  %4971 = vmatprep.mubr.msk.f32.mxu0 %vm249_vm1, %v5436_v55  ;;  %v6739_v55 = vld [vmem:[#allocation22_spill] sm:$0xff] }
  0xb9   : > { %4921 = vmatprep.mubr.msk.f32.mxu1 %vm249_vm1, %v6724_v20 }
  0xbb   : > { %4972 = vmatmul.mubr.msk.f32.gmra.mxu0 %vm249_vm1, %v5450_v57  ;;  %v6740_v57 = vld [vmem:[#allocation23_spill] sm:$0xff] }
  0xbc   : > { %4922 = vmatmul.mubr.msk.f32.gmra.mxu1 %vm249_vm1, %v6725_v22  ;;  %4974 = vmatprep.mubr.msk.f32.mxu0 %vm249_vm1, %v5456_v59 }
  0xbd   : > { %4924 = vmatprep.mubr.msk.f32.mxu1 %vm249_vm1, %v6726_v24 }
  0xbf   : > { %4975 = vmatmul.mubr.msk.f32.gmra.mxu0 %vm249_vm1, %v5470_v61 }
  0xc0   : > { %4925 = vmatmul.mubr.msk.f32.gmra.mxu1 %vm249_vm1, %v6727_v26  ;;  %4977 = vmatprep.mubr.msk.f32.mxu0 %vm249_vm1, %v5476_v63 }
  0xc1   : > { %4927 = vmatprep.mubr.msk.f32.mxu1 %vm249_vm1, %v6728_v28 }
  0xc3   : > { %4978 = vmatmul.mubr.msk.f32.gmra.mxu0 %vm249_vm1, %v5490_v1 }
  0xc4   : > { %4928 = vmatmul.mubr.msk.f32.gmra.mxu1 %vm249_vm1, %v6729_v29  ;;  %4980 = vmatprep.mubr.msk.f32.mxu0 %vm249_vm1, %v5496_v3 }
  0xc5   : > { %4930 = vmatprep.mubr.msk.f32.mxu1 %vm249_vm1, %v6730_v30 }
  0xc7   : > { %4981 = vmatmul.mubr.msk.f32.gmra.mxu0 %vm249_vm1, %v5510_v9 }
  0xc8   : > { %4931 = vmatmul.mubr.msk.f32.gmra.mxu1 %vm249_vm1, %v6731_v31  ;;  %4983 = vmatprep.mubr.msk.f32.mxu0 %vm249_vm1, %v5516_v37 }
  0xc9   : > { %4933 = vmatprep.mubr.msk.f32.mxu1 %vm249_vm1, %v6732_v32 }
  0xcb   : > { %4984 = vmatmul.mubr.msk.f32.gmra.mxu0 %vm249_vm1, %v5530_v39 }
  0xcc   : > { %4934 = vmatmul.mubr.msk.f32.gmra.mxu1 %vm249_vm1, %v6733_v33  ;;  %4986 = vmatprep.mubr.msk.f32.mxu0 %vm249_vm1, %v5536_v5  ;;  %v6743_v5 = vld [vmem:[#allocation26_spill] sm:$0xff] }
  0xcd   : > { %4936 = vmatprep.mubr.msk.f32.mxu1 %vm249_vm1, %v6734_v34 }
  0xcf   : > { %4987 = vmatmul.mubr.msk.f32.gmra.mxu0 %vm249_vm1, %v5550_v38  ;;  %v6746_v38 = vld [vmem:[#allocation28_spill] sm:$0xff] }
  0xd0   : > { %4937 = vmatmul.mubr.msk.f32.gmra.mxu1 %vm249_vm1, %v6735_v35  ;;  %4989 = vmatprep.mubr.msk.f32.mxu0 %vm249_vm1, %v5556_v0  ;;  %v6741_v0 = vld [vmem:[#allocation24_spill] sm:$0xff] }
  0xd1   : > { %4939 = vmatprep.mubr.msk.f32.mxu1 %vm249_vm1, %v6736_v36 }
  0xd3   : > { %v5909_v41 = vpop.f32.mrf.mxu0  ;;  %4990 = vmatmul.mubr.msk.f32.gmra.mxu0 %vm249_vm1, %v5570_v2 }
  0xd4   : > { %v5911_v43 = vpop.f32.mrf.mxu1  ;;  %4940 = vmatmul.mubr.msk.f32.gmra.mxu1 %vm249_vm1, %v6737_v44  ;;  %4992 = vmatprep.mubr.msk.f32.mxu0 %vm249_vm1, %v5576_v60 }
  0xd5   : > { %4942 = vmatprep.mubr.msk.f32.mxu1 %vm249_vm1, %v6738_v45  ;;  %v5921_v47 = vpop.f32.mrf.mxu0 }
  0xd6   : > { %v5923_v49 = vpop.f32.mrf.mxu1 }
  0xd7   : > { %v5925_v51 = vpop.f32.mrf.mxu0  ;;  %4993 = vmatmul.mubr.msk.f32.gmra.mxu0 %vm249_vm1, %v5590_v62  ;;  %v6742_v62 = vld [vmem:[#allocation25_spill] sm:$0xff] }
  0xd8   : > { %v5927_v53 = vpop.f32.mrf.mxu1  ;;  %4943 = vmatmul.mubr.msk.f32.gmra.mxu1 %vm249_vm1, %v6739_v55  ;;  %4995 = vmatprep.mubr.msk.f32.mxu0 %vm249_vm1, %v5596_v56 }
  0xd9   : > { %4945 = vmatprep.mubr.msk.f32.mxu1 %vm249_vm1, %v6740_v57  ;;  %v5937_v59 = vpop.f32.mrf.mxu0 }
  0xda   : > { %v5939_v60 = vpop.f32.mrf.mxu1 }
  0xdb   : > { %v5941_v61 = vpop.f32.mrf.mxu0  ;;  %4996 = vmatmul.mubr.msk.f32.gmra.mxu0 %vm249_vm1, %v5610_v58  ;;  %v6744_v58 = vld [vmem:[#allocation27_spill] sm:$0xff] }
  0xdc   : > { %v5943_v63 = vpop.f32.mrf.mxu1  ;;  %4946 = vmatmul.mubr.msk.f32.gmra.mxu1 %vm249_vm1, %v6741_v0  ;;  %4998 = vmatprep.mubr.msk.f32.mxu0 %vm249_vm1, %v5616_v52 }
  0xdd   : > { %4948 = vmatprep.mubr.msk.f32.mxu1 %vm249_vm1, %v6742_v62  ;;  %v5953_v56 = vpop.f32.mrf.mxu0 }
  0xde   : > { %v5955_v1 = vpop.f32.mrf.mxu1 }
  0xdf   : > { %v5957_v2 = vpop.f32.mrf.mxu0  ;;  %4999 = vmatmul.mubr.msk.f32.gmra.mxu0 %vm249_vm1, %v5630_v54  ;;  %v6747_v54 = vld [vmem:[#allocation29_spill] sm:$0xff] }
  0xe0   : > { %v5959_v3 = vpop.f32.mrf.mxu1  ;;  %4949 = vmatmul.mubr.msk.f32.gmra.mxu1 %vm249_vm1, %v6743_v5  ;;  %5001 = vmatprep.mubr.msk.f32.mxu0 %vm249_vm1, %v5636_v48 }
  0xe1   : > { %4951 = vmatprep.mubr.msk.f32.mxu1 %vm249_vm1, %v6744_v58  ;;  %v5969_v52 = vpop.f32.mrf.mxu0 }
  0xe2   : > { %v5971_v9 = vpop.f32.mrf.mxu1 }
  0xe3   : > { %v5973_v10 = vpop.f32.mrf.mxu0  ;;  %5002 = vmatmul.mubr.msk.f32.gmra.mxu0 %vm249_vm1, %v5650_v50  ;;  %v6750_v50 = vld [vmem:[#allocation31_spill] sm:$0xff] }
  0xe4   : > { %v5975_v37 = vpop.f32.mrf.mxu1  ;;  %4952 = vmatmul.mubr.msk.f32.gmra.mxu1 %vm249_vm1, %v6746_v38  ;;  %5004 = vmatprep.mubr.msk.f32.mxu0 %vm249_vm1, %v5656_v42 }
  0xe5   : > { %6745 = vst [vmem:[#allocation3_spill] sm:$0xff] %v5975_v37  ;;  %4954 = vmatprep.mubr.msk.f32.mxu1 %vm249_vm1, %v6747_v54  ;;  %v5985_v48 = vpop.f32.mrf.mxu0  ;;  %v6754_v37 = vld [vmem:[#allocation32_spill] sm:$0xff] }
  0xe6   : > { %v5987_v39 = vpop.f32.mrf.mxu1 }
  0xe7   : > { %6748 = vst [vmem:[#allocation4_spill] sm:$0xff] %v5987_v39  ;;  %v5989_v7 = vpop.f32.mrf.mxu0  ;;  %5005 = vmatmul.mubr.msk.f32.gmra.mxu0 %vm249_vm1, %v5670_v46  ;;  %v6021_v46 = vld [vmem:[%s5181_s23 + $0x18a] sm:$0xff] }
  0xe8   : > { %v5991_v12 = vpop.f32.mrf.mxu1  ;;  %4955 = vmatmul.mubr.msk.f32.gmra.mxu1 %vm249_vm1, %v5653_v40  ;;  %5007 = vmatprep.mubr.msk.f32.mxu0 %vm249_vm1, %v5814_v4  ;;  %6755 = vst [vmem:[#allocation9_spill] sm:$0xff] %v6021_v46  ;;  %v4196_v4 = vld [vmem:[%s5181_s23 + $0x1a0] sm:$0xff] }
  0xe9   : > { %6749 = vst [vmem:[#allocation5_spill] sm:$0xff] %v5991_v12  ;;  %4957 = vmatprep.mubr.msk.f32.mxu1 %vm249_vm1, %v6750_v50  ;;  %v6001_v42 = vpop.f32.mrf.mxu0 }
  0xea   : > { %v6003_v14 = vpop.f32.mrf.mxu1 }
  0xeb   : > { %6751 = vst [vmem:[#allocation6_spill] sm:$0xff] %v6003_v14  ;;  %v6009_v12 = vpop.f32.mrf.mxu0  ;;  %5008 = vmatmul.mubr.msk.f32.gmra.mxu0 %vm249_vm1, %v5828_v8 }
  0xec   : > { %v6011_v39 = vpop.f32.mrf.mxu1  ;;  %4958 = vmatmul.mubr.msk.f32.gmra.mxu1 %vm249_vm1, %v6754_v37  ;;  %5010 = vmatprep.mubr.msk.f32.mxu0 %vm249_vm1, %v4195_v6 }
  0xed   : > { %6753 = vst [vmem:[#allocation8_spill] sm:$0xff] %v6011_v39  ;;  %4960 = vmatprep.mubr.msk.f32.mxu1 %vm249_vm1, %v6006_v11  ;;  %v6024_v50 = vpop.f32.mrf.mxu0 }
  0xee   : > { %v6026_v14 = vpop.f32.mrf.mxu1 }
  0xef   : > { %6756 = vst [vmem:[#allocation10_spill] sm:$0xff] %v6026_v14  ;;  %v6028_v40 = vpop.f32.mrf.mxu0  ;;  %5011 = vmatmul.mubr.msk.f32.gmra.mxu0 %vm249_vm1, %v4196_v4 }
  0xf0   : > { %v6030_v39 = vpop.f32.mrf.mxu1  ;;  %4961 = vmatmul.mubr.msk.f32.gmra.mxu1 %vm249_vm1, %v6021_v46  ;;  %5065 = vmatprep.mubr.msk.f32.mxu0 %vm249_vm1, %v6722_v16 }
  0xf1   : > { %6757 = vst [vmem:[#allocation11_spill] sm:$0xff] %v6030_v39  ;;  %5015 = vmatprep.mubr.msk.f32.mxu1 %vm249_vm1, %v5226_v13  ;;  %v6039_v6 = vpop.f32.mrf.mxu0 }
  0xf2   : > { %v6041_v8 = vpop.f32.mrf.mxu1 }
  0xf3   : > { %6758 = vst [vmem:[#allocation12_spill] sm:$0xff] %v6041_v8  ;;  %v4767_v14 = vpop.f32.mrf.mxu0  ;;  %5066 = vmatmul.mubr.msk.f32.vlgmr.msra.gmra.mxu0 %vm249_vm1, %v6723_v18 }
  0xf4   : > { %v4717_v37 = vpop.f32.mrf.mxu1  ;;  %5016 = vmatmul.mubr.msk.f32.vlgmr.msra.gmra.mxu1 %vm249_vm1, %v5244_v15  ;;  %5068 = vmatprep.mubr.msk.f32.mxu0 %vm249_vm1, %v6724_v20 }
  0xf5   : > { %v746_v4 = vadd.f32 %v4717_v37, %v5909_v41  ;;  %5018 = vmatprep.mubr.msk.f32.mxu1 %vm249_vm1, %v5250_v17  ;;  %v1098_v16 = vpop.f32.mrf.mxu0  ;;  %v4241_v37 = vld [vmem:[%s5181_s23 + $0xa9] sm:$0xff] }
  0xf6   : > { %v740_v13 = vpop.f32.mrf.mxu1 }
  0xf7   : > { %v6052_v39 = vadd.f32 %v4767_v14, %v746_v4  ;;  %v741_v8 = vadd.f32 %v740_v13, %v5921_v47  ;;  %v4770_v11 = vpop.f32.mrf.mxu0  ;;  %5069 = vmatmul.mubr.msk.f32.gmra.mxu0 %vm249_vm1, %v6725_v22 }
  0xf8   : > { %v4720_v46 = vpop.f32.mrf.mxu1  ;;  %5019 = vmatmul.mubr.msk.f32.gmra.mxu1 %vm249_vm1, %v5264_v19  ;;  %5071 = vmatprep.mubr.msk.f32.mxu0 %vm249_vm1, %v6726_v24 }
  0xf9   : > { %v6059_v15 = vadd.f32 %v1098_v16, %v741_v8  ;;  %v756_v17 = vadd.f32 %v4720_v46, %v5925_v51  ;;  %5021 = vmatprep.mubr.msk.f32.mxu1 %vm249_vm1, %v5270_v21  ;;  %v1108_v20 = vpop.f32.mrf.mxu0  ;;  %v4239_v51 = vld [vmem:[%s5181_s23 + $0x91] sm:$0xff] }
  0xfa   : > { %v750_v18 = vpop.f32.mrf.mxu1  ;;  %v4242_v16 = vld [vmem:[%s5181_s23 + $0xb1] sm:$0xff] }
  0xfb   : > { %v6066_v41 = vadd.f32 %v4770_v11, %v756_v17  ;;  %v751_v19 = vadd.f32 %v750_v18, %v5937_v59  ;;  %v4773_v14 = vpop.f32.mrf.mxu0  ;;  %5072 = vmatmul.mubr.msk.f32.gmra.mxu0 %vm249_vm1, %v6727_v26  ;;  %v4243_v18 = vld [vmem:[%s5181_s23 + $0xc1] sm:$0xff] }
  0xfc   : > { %v4723_v47 = vpop.f32.mrf.mxu1  ;;  %5022 = vmatmul.mubr.msk.f32.gmra.mxu1 %vm249_vm1, %v5284_v23  ;;  %5074 = vmatprep.mubr.msk.f32.mxu0 %vm249_vm1, %v6728_v28 }
  0xfd   : > { %v6073_v22 = vadd.f32 %v1108_v20, %v751_v19  ;;  %v766_v21 = vadd.f32 %v4723_v47, %v5941_v61  ;;  %5024 = vmatprep.mubr.msk.f32.mxu1 %vm249_vm1, %v5290_v25  ;;  %v1118_v24 = vpop.f32.mrf.mxu0  ;;  %v4240_v61 = vld [vmem:[%s5181_s23 + $0x99] sm:$0xff] }
  0xfe   : > { %v760_v11 = vpop.f32.mrf.mxu1 }
  0xff   : > { %v6081_v59 = vadd.f32 %v4773_v14, %v766_v21  ;;  %v761_v23 = vadd.f32 %v760_v11, %v5953_v56  ;;  %v4776_v46 = vpop.f32.mrf.mxu0  ;;  %5075 = vmatmul.mubr.msk.f32.gmra.mxu0 %vm249_vm1, %v6729_v29  ;;  %v4244_v14 = vld [vmem:[%s5181_s23 + $0xc9] sm:$0xff]  ;;  %v4245_v11 = vld [vmem:[%s5181_s23 + $0xd9] sm:$0xff] }
 0x100   : > { %v4726_v26 = vpop.f32.mrf.mxu1  ;;  %5025 = vmatmul.mubr.msk.f32.gmra.mxu1 %vm249_vm1, %v5304_v27  ;;  %5077 = vmatprep.mubr.msk.f32.mxu0 %vm249_vm1, %v6730_v30 }
 0x101   : > { %v6088_v25 = vadd.f32 %v1118_v24, %v761_v23  ;;  %v776_v28 = vadd.f32 %v4726_v26, %v5957_v2  ;;  %5027 = vmatprep.mubr.msk.f32.mxu1 %vm249_vm1, %v4239_v51  ;;  %v1128_v8 = vpop.f32.mrf.mxu0  ;;  %v4246_v26 = vld [vmem:[%s5181_s23 + $0xe1] sm:$0xff] }
 0x102   : > { %v770_v56 = vpop.f32.mrf.mxu1 }
 0x103   : > { %v6096_v4 = vadd.f32 %v4776_v46, %v776_v28  ;;  %v771_v27 = vadd.f32 %v770_v56, %v5969_v52  ;;  %v4779_v13 = vpop.f32.mrf.mxu0  ;;  %5078 = vmatmul.mubr.msk.f32.gmra.mxu0 %vm249_vm1, %v6731_v31  ;;  %v4247_v28 = vld [vmem:[%s5181_s23 + $0xf1] sm:$0xff] }
 0x104   : > { %v4729_v29 = vpop.f32.mrf.mxu1  ;;  %5028 = vmatmul.mubr.msk.f32.gmra.mxu1 %vm249_vm1, %v4240_v61  ;;  %5080 = vmatprep.mubr.msk.f32.mxu0 %vm249_vm1, %v6732_v32 }
 0x105   : > { %v6102_v2 = vadd.f32 %v1128_v8, %v771_v27  ;;  %v786_v30 = vadd.f32 %v4729_v29, %v5973_v10  ;;  %5030 = vmatprep.mubr.msk.f32.mxu1 %vm249_vm1, %v4241_v37  ;;  %v1138_v52 = vpop.f32.mrf.mxu0  ;;  %v4248_v37 = vld [vmem:[%s5181_s23 + $0xf9] sm:$0xff]  ;;  %v4249_v29 = vld [vmem:[%s5181_s23 + $0x109] sm:$0xff] }
 0x106   : > { %v780_v17 = vpop.f32.mrf.mxu1 }
 0x107   : > { %v6110_v20 = vadd.f32 %v4779_v13, %v786_v30  ;;  %v781_v19 = vadd.f32 %v780_v17, %v5985_v48  ;;  %v4782_v47 = vpop.f32.mrf.mxu0  ;;  %5081 = vmatmul.mubr.msk.f32.gmra.mxu0 %vm249_vm1, %v6733_v33  ;;  %v4250_v17 = vld [vmem:[%s5181_s23 + $0x111] sm:$0xff] }
 0x108   : > { %v4732_v31 = vpop.f32.mrf.mxu1  ;;  %5031 = vmatmul.mubr.msk.f32.gmra.mxu1 %vm249_vm1, %v4242_v16  ;;  %5083 = vmatprep.mubr.msk.f32.mxu0 %vm249_vm1, %v6734_v34 }
 0x109   : > { %v6116_v10 = vadd.f32 %v1138_v52, %v781_v19  ;;  %v796_v32 = vadd.f32 %v4732_v31, %v5989_v7  ;;  %5033 = vmatprep.mubr.msk.f32.mxu1 %vm249_vm1, %v4243_v18  ;;  %v1148_v48 = vpop.f32.mrf.mxu0  ;;  %v4251_v18 = vld [vmem:[%s5181_s23 + $0x121] sm:$0xff] }
 0x10a   : > { %v790_v21 = vpop.f32.mrf.mxu1 }
 0x10b   : > { %v6124_v24 = vadd.f32 %v4782_v47, %v796_v32  ;;  %v791_v51 = vadd.f32 %v790_v21, %v6001_v42  ;;  %v4785_v23 = vpop.f32.mrf.mxu0  ;;  %5084 = vmatmul.mubr.msk.f32.gmra.mxu0 %vm249_vm1, %v6735_v35  ;;  %v4252_v32 = vld [vmem:[%s5181_s23 + $0x129] sm:$0xff]  ;;  %v4253_v21 = vld [vmem:[%s5181_s23 + $0x139] sm:$0xff] }
 0x10c   : > { %v4735_v33 = vpop.f32.mrf.mxu1  ;;  %5034 = vmatmul.mubr.msk.f32.gmra.mxu1 %vm249_vm1, %v4244_v14  ;;  %5086 = vmatprep.mubr.msk.f32.mxu0 %vm249_vm1, %v6736_v36 }
 0x10d   : > { %v6130_v7 = vadd.f32 %v1148_v48, %v791_v51  ;;  %v806_v34 = vadd.f32 %v4735_v33, %v6009_v12  ;;  %5036 = vmatprep.mubr.msk.f32.mxu1 %vm249_vm1, %v4245_v11  ;;  %v1158_v42 = vpop.f32.mrf.mxu0  ;;  %v4254_v33 = vld [vmem:[%s5181_s23 + $0x141] sm:$0xff] }
 0x10e   : > { %v800_v46 = vpop.f32.mrf.mxu1 }
 0x10f   : > { %v6138_v61 = vadd.f32 %v4785_v23, %v806_v34  ;;  %v801_v56 = vadd.f32 %v800_v46, %v6024_v50  ;;  %v4788_v8 = vpop.f32.mrf.mxu0  ;;  %5087 = vmatmul.mubr.msk.f32.gmra.mxu0 %vm249_vm1, %v6737_v44  ;;  %v4255_v34 = vld [vmem:[%s5181_s23 + $0x151] sm:$0xff] }
 0x110   : > { %v4738_v35 = vpop.f32.mrf.mxu1  ;;  %5037 = vmatmul.mubr.msk.f32.gmra.mxu1 %vm249_vm1, %v4246_v26  ;;  %5089 = vmatprep.mubr.msk.f32.mxu0 %vm249_vm1, %v6738_v45 }
 0x111   : > { %v6144_v12 = vadd.f32 %v1158_v42, %v801_v56  ;;  %v816_v36 = vadd.f32 %v4738_v35, %v6028_v40  ;;  %5039 = vmatprep.mubr.msk.f32.mxu1 %vm249_vm1, %v4247_v28  ;;  %v1168_v50 = vpop.f32.mrf.mxu0  ;;  %v4256_v28 = vld [vmem:[%s5181_s23 + $0x159] sm:$0xff]  ;;  %v4257_v35 = vld [vmem:[%s5181_s23 + $0x169] sm:$0xff] }
 0x112   : > { %v810_v27 = vpop.f32.mrf.mxu1 }
 0x113   : > { %v6152_v13 = vadd.f32 %v4788_v8, %v816_v36  ;;  %v811_v30 = vadd.f32 %v810_v27, %v6039_v6  ;;  %v4791_v16 = vpop.f32.mrf.mxu0  ;;  %5090 = vmatmul.mubr.msk.f32.gmra.mxu0 %vm249_vm1, %v6739_v55  ;;  %v4323_v8 = vld [vmem:[%s5181_s23 + $0x16a] sm:$0xff] }
 0x114   : > { %v4741_v44 = vpop.f32.mrf.mxu1  ;;  %5040 = vmatmul.mubr.msk.f32.gmra.mxu1 %vm249_vm1, %v4248_v37  ;;  %5092 = vmatprep.mubr.msk.f32.mxu0 %vm249_vm1, %v6740_v57 }
 0x115   : > { %v6158_v40 = vadd.f32 %v1168_v50, %v811_v30  ;;  %v826_v45 = vadd.f32 %v4741_v44, %v5911_v43  ;;  %5042 = vmatprep.mubr.msk.f32.mxu1 %vm249_vm1, %v4249_v29  ;;  %v1178_v6 = vpop.f32.mrf.mxu0  ;;  %v4258_v30 = vld [vmem:[%s5181_s23 + $0x171] sm:$0xff] }
 0x116   : > { %v820_v52 = vpop.f32.mrf.mxu1  ;;  %v4324_v44 = vld [vmem:[%s5181_s23 + $0x172] sm:$0xff] }
 0x117   : > { %v6166_v19 = vadd.f32 %v4791_v16, %v826_v45  ;;  %v821_v31 = vadd.f32 %v820_v52, %v5923_v49  ;;  %v4794_v47 = vpop.f32.mrf.mxu0  ;;  %5093 = vmatmul.mubr.msk.f32.gmra.mxu0 %vm249_vm1, %v6741_v0 }
 0x118   : > { %v4744_v55 = vpop.f32.mrf.mxu1  ;;  %5043 = vmatmul.mubr.msk.f32.gmra.mxu1 %vm249_vm1, %v4250_v17  ;;  %5095 = vmatprep.mubr.msk.f32.mxu0 %vm249_vm1, %v6742_v62  ;;  %v6761_v17 = vld [vmem:[#allocation4_spill] sm:$0xff] }
 0x119   : > { %v6172_v43 = vadd.f32 %v1178_v6, %v821_v31  ;;  %v836_v57 = vadd.f32 %v4744_v55, %v5927_v53  ;;  %5045 = vmatprep.mubr.msk.f32.mxu1 %vm249_vm1, %v4251_v18  ;;  %v1188_v49 = vpop.f32.mrf.mxu0  ;;  %v6762_v55 = vld [vmem:[#allocation5_spill] sm:$0xff] }
 0x11a   : > { %v830_v14 = vpop.f32.mrf.mxu1 }
 0x11b   : > { %v6180_v48 = vadd.f32 %v4794_v47, %v836_v57  ;;  %v831_v11 = vadd.f32 %v830_v14, %v5939_v60  ;;  %v4797_v51 = vpop.f32.mrf.mxu0  ;;  %5096 = vmatmul.mubr.msk.f32.gmra.mxu0 %vm249_vm1, %v6743_v5  ;;  %v6763_v57 = vld [vmem:[#allocation33_spill] sm:$0xff] }
 0x11c   : > { %v4747_v0 = vpop.f32.mrf.mxu1  ;;  %5046 = vmatmul.mubr.msk.f32.gmra.mxu1 %vm249_vm1, %v4252_v32  ;;  %5098 = vmatprep.mubr.msk.f32.mxu0 %vm249_vm1, %v6744_v58  ;;  %v6764_v32 = vld [vmem:[#allocation7_spill] sm:$0xff] }
 0x11d   : > { %v6186_v53 = vadd.f32 %v1188_v49, %v831_v11  ;;  %v846_v62 = vadd.f32 %v4747_v0, %v5943_v63  ;;  %5048 = vmatprep.mubr.msk.f32.mxu1 %vm249_vm1, %v4253_v21  ;;  %v1198_v60 = vpop.f32.mrf.mxu0  ;;  %v4261_v21 = vld [vmem:[%s5181_s23 + $0x199] sm:$0xff] }
 0x11e   : > { %v840_v23 = vpop.f32.mrf.mxu1  ;;  %v4327_v11 = vld [vmem:[%s5181_s23 + $0x19a] sm:$0xff] }
 0x11f   : > { %v6194_v26 = vadd.f32 %v4797_v51, %v846_v62  ;;  %v841_v5 = vadd.f32 %v840_v23, %v5955_v1  ;;  %v4800_v42 = vpop.f32.mrf.mxu0  ;;  %5099 = vmatmul.mubr.msk.f32.gmra.mxu0 %vm249_vm1, %v6746_v38  ;;  %v6765_v51 = vld [vmem:[#allocation6_spill] sm:$0xff] }
 0x120   : > { %v4750_v46 = vpop.f32.mrf.mxu1  ;;  %5049 = vmatmul.mubr.msk.f32.gmra.mxu1 %vm249_vm1, %v4254_v33  ;;  %5101 = vmatprep.mubr.msk.f32.mxu0 %vm249_vm1, %v6747_v54  ;;  %v6760_v54 = vld [vmem:[#allocation3_spill] sm:$0xff] }
 0x121   : > { %v6200_v63 = vadd.f32 %v1198_v60, %v841_v5  ;;  %v856_v58 = vadd.f32 %v4750_v46, %v5959_v3  ;;  %5051 = vmatprep.mubr.msk.f32.mxu1 %vm249_vm1, %v4255_v34  ;;  %v1208_v56 = vpop.f32.mrf.mxu0  ;;  %v6759_v3 = vld [vmem:[#allocation30_spill] sm:$0xff]  ;;  %v6767_v34 = vld [vmem:[#allocation9_spill] sm:$0xff]  ;;  %v6768_v46 = vld [vmem:[#allocation8_spill] sm:$0xff] }
 0x122   : > { %v850_v1 = vpop.f32.mrf.mxu1  ;;  %v6766_v60 = vld [vmem:[#allocation2_spill] sm:$0xff] }
 0x123   : > { %v6209_v36 = vadd.f32 %v4800_v42, %v856_v58  ;;  %v851_v38 = vadd.f32 %v850_v1, %v5971_v9  ;;  %v4803_v27 = vpop.f32.mrf.mxu0  ;;  %5102 = vmatmul.mubr.msk.f32.gmra.mxu0 %vm249_vm1, %v6759_v3  ;;  %v4262_v58 = vld [vmem:[%s5181_s23 + $0x1a1] sm:$0xff] }
 0x124   : > { %v4753_v37 = vpop.f32.mrf.mxu1  ;;  %5052 = vmatmul.mubr.msk.f32.gmra.mxu1 %vm249_vm1, %v4256_v28  ;;  %5104 = vmatprep.mubr.msk.f32.mxu0 %vm249_vm1, %v4323_v8  ;;  %v4328_v28 = vld [vmem:[%s5181_s23 + $0x1a2] sm:$0xff] }
 0x125   : > { %v6215_v50 = vadd.f32 %v1208_v56, %v851_v38  ;;  %v866_v29 = vadd.f32 %v4753_v37, %v6760_v54  ;;  %5054 = vmatprep.mubr.msk.f32.mxu1 %vm249_vm1, %v4257_v35  ;;  %v1218_v16 = vpop.f32.mrf.mxu0  ;;  %v6769_v8 = vld [vmem:[#allocation10_spill] sm:$0xff]  ;;  %v6770_v54 = vld [vmem:[#allocation11_spill] sm:$0xff] }
 0x126   : > { %v860_v9 = vpop.f32.mrf.mxu1 }
 0x127   : > { %v6222_v45 = vadd.f32 %v4803_v27, %v866_v29  ;;  %v861_v52 = vadd.f32 %v860_v9, %v6761_v17  ;;  %v4806_v18 = vpop.f32.mrf.mxu0  ;;  %5105 = vmatmul.mubr.msk.f32.gmra.mxu0 %vm249_vm1, %v4324_v44 }
 0x128   : > { %v4756_v6 = vpop.f32.mrf.mxu1  ;;  %5055 = vmatmul.mubr.msk.f32.gmra.mxu1 %vm249_vm1, %v4258_v30  ;;  %5107 = vmatprep.mubr.msk.f32.mxu0 %vm249_vm1, %v6764_v32 }
 0x129   : > { %v6227_v31 = vadd.f32 %v1218_v16, %v861_v52  ;;  %v876_v47 = vadd.f32 %v4756_v6, %v6762_v55  ;;  %5057 = vmatprep.mubr.msk.f32.mxu1 %vm249_vm1, %v6763_v57  ;;  %v1228_v49 = vpop.f32.mrf.mxu0  ;;  %v6771_v16 = vld [vmem:[#allocation12_spill] sm:$0xff] }
 0x12a   : > { %v870_v14 = vpop.f32.mrf.mxu1 }
 0x12b   : > { %v6236_v0 = vadd.f32 %v4806_v18, %v876_v47  ;;  %v871_v62 = vadd.f32 %v870_v14, %v6765_v51  ;;  %v4809_v23 = vpop.f32.mrf.mxu0  ;;  %5108 = vmatmul.mubr.msk.f32.gmra.mxu0 %vm249_vm1, %v6767_v34 }
 0x12c   : > { %v4759_v33 = vpop.f32.mrf.mxu1  ;;  %5058 = vmatmul.mubr.msk.f32.gmra.mxu1 %vm249_vm1, %v6766_v60  ;;  %5110 = vmatprep.mubr.msk.f32.mxu0 %vm249_vm1, %v4327_v11 }
 0x12d   : > { %v6243_v5 = vadd.f32 %v1228_v49, %v871_v62  ;;  %v886_v42 = vadd.f32 %v4759_v33, %v6768_v46  ;;  %5060 = vmatprep.mubr.msk.f32.mxu1 %vm249_vm1, %v4261_v21  ;;  %v1238_v56 = vpop.f32.mrf.mxu0 }
 0x12e   : > { %v880_v1 = vpop.f32.mrf.mxu1 }
 0x12f   : > { %v6250_v35 = vadd.f32 %v4809_v23, %v886_v42  ;;  %v881_v38 = vadd.f32 %v880_v1, %v6769_v8  ;;  %v4812_v27 = vpop.f32.mrf.mxu0  ;;  %5111 = vmatmul.mubr.msk.f32.gmra.mxu0 %vm249_vm1, %v4328_v28 }
 0x130   : > { %v4762_v37 = vpop.f32.mrf.mxu1  ;;  %5061 = vmatmul.mubr.msk.f32.gmra.mxu1 %vm249_vm1, %v4262_v58 }
 0x131   : > { %v6255_v3 = vadd.f32 %v1238_v56, %v881_v38  ;;  %v896_v29 = vadd.f32 %v4762_v37, %v6770_v54  ;;  %v1248_v44 = vpop.f32.mrf.mxu0 }
 0x132   : > { %v890_v30 = vpop.f32.mrf.mxu1 }
 0x133   : > { %v6258_v9 = vadd.f32 %v4812_v27, %v896_v29  ;;  %v891_v17 = vadd.f32 %v890_v30, %v6771_v16  ;;  %v4867_v6 = vpop.f32.mrf.mxu0 }
 0x134   : > { %v4817_v52 = vpop.f32.mrf.mxu1 }
 0x135   : > { %v6261_v18 = vadd.f32 %v1248_v44, %v891_v17  ;;  %v1649_v55 = vadd.f32 %v4817_v52, %v6052_v39  ;;  %v1879_v57 = vpop.f32.mrf.mxu0 }
 0x136   : > { %v1489_v47 = vpop.f32.mrf.mxu1 }
 0x137   : > { %v6264_v32 = vadd.f32 %v4867_v6, %v1649_v55  ;;  %v1648_v14 = vadd.f32 %v1489_v47, %v6059_v15  ;;  %v4870_v21 = vpop.f32.mrf.mxu0 }
 0x138   : > { %v4820_v49 = vpop.f32.mrf.mxu1 }
 0x139   : > { %v6267_v11 = vadd.f32 %v1879_v57, %v1648_v14  ;;  %v1651_v51 = vadd.f32 %v4820_v49, %v6066_v41  ;;  %v1889_v33 = vpop.f32.mrf.mxu0 }
 0x13a   : > { %v1499_v62 = vpop.f32.mrf.mxu1 }
 0x13b   : > { %v6270_v23 = vadd.f32 %v4870_v21, %v1651_v51  ;;  %v1650_v60 = vadd.f32 %v1499_v62, %v6073_v22  ;;  %v4873_v39 = vpop.f32.mrf.mxu0 }
 0x13c   : > { %v4823_v34 = vpop.f32.mrf.mxu1 }
 0x13d   : > { %v6273_v46 = vadd.f32 %v1889_v33, %v1650_v60  ;;  %v1653_v42 = vadd.f32 %v4823_v34, %v6081_v59  ;;  %v1899_v15 = vpop.f32.mrf.mxu0 }
 0x13e   : > { %v1509_v58 = vpop.f32.mrf.mxu1 }
 0x13f   : > { %v6276_v28 = vadd.f32 %v4873_v39, %v1653_v42  ;;  %v1652_v1 = vadd.f32 %v1509_v58, %v6088_v25  ;;  %v4876_v41 = vpop.f32.mrf.mxu0 }
 0x140   : > { %v4826_v56 = vpop.f32.mrf.mxu1 }
 0x141   : > { %v6279_v8 = vadd.f32 %v1899_v15, %v1652_v1  ;;  %v1655_v38 = vadd.f32 %v4826_v56, %v6096_v4  ;;  %v1909_v22 = vpop.f32.mrf.mxu0 }
 0x142   : > { %v1519_v37 = vpop.f32.mrf.mxu1 }
 0x143   : > { %v6282_v27 = vadd.f32 %v4876_v41, %v1655_v38  ;;  %v1654_v54 = vadd.f32 %v1519_v37, %v6102_v2  ;;  %v4879_v59 = vpop.f32.mrf.mxu0 }
 0x144   : > { %v4829_v29 = vpop.f32.mrf.mxu1 }
 0x145   : > { %v6285_v30 = vadd.f32 %v1909_v22, %v1654_v54  ;;  %v1657_v44 = vadd.f32 %v4829_v29, %v6110_v20  ;;  %v1919_v25 = vpop.f32.mrf.mxu0 }
 0x146   : > { %v1529_v16 = vpop.f32.mrf.mxu1 }
 0x147   : > { %v6288_v17 = vadd.f32 %v4879_v59, %v1657_v44  ;;  %v1656_v52 = vadd.f32 %v1529_v16, %v6116_v10  ;;  %v4882_v4 = vpop.f32.mrf.mxu0 }
 0x148   : > { %v4832_v6 = vpop.f32.mrf.mxu1 }
 0x149   : > { %v6291_v55 = vadd.f32 %v1919_v25, %v1656_v52  ;;  %v1659_v47 = vadd.f32 %v4832_v6, %v6124_v24  ;;  %v1929_v2 = vpop.f32.mrf.mxu0 }
 0x14a   : > { %v1539_v57 = vpop.f32.mrf.mxu1 }
 0x14b   : > { %v6294_v14 = vadd.f32 %v4882_v4, %v1659_v47  ;;  %v1658_v49 = vadd.f32 %v1539_v57, %v6130_v7  ;;  %v4885_v20 = vpop.f32.mrf.mxu0 }
 0x14c   : > { %v4835_v21 = vpop.f32.mrf.mxu1 }
 0x14d   : > { %v6297_v51 = vadd.f32 %v1929_v2, %v1658_v49  ;;  %v1661_v62 = vadd.f32 %v4835_v21, %v6138_v61  ;;  %v1939_v10 = vpop.f32.mrf.mxu0 }
 0x14e   : > { %v1549_v33 = vpop.f32.mrf.mxu1 }
 0x14f   : > { %v6300_v60 = vadd.f32 %v4885_v20, %v1661_v62  ;;  %v1660_v34 = vadd.f32 %v1549_v33, %v6144_v12  ;;  %v4888_v24 = vpop.f32.mrf.mxu0 }
 0x150   : > { %v4838_v39 = vpop.f32.mrf.mxu1 }
 0x151   : > { %v6303_v42 = vadd.f32 %v1939_v10, %v1660_v34  ;;  %v1663_v58 = vadd.f32 %v4838_v39, %v6152_v13  ;;  %v1949_v7 = vpop.f32.mrf.mxu0 }
 0x152   : > { %v1559_v15 = vpop.f32.mrf.mxu1 }
 0x153   : > { %v6306_v1 = vadd.f32 %v4888_v24, %v1663_v58  ;;  %v1662_v56 = vadd.f32 %v1559_v15, %v6158_v40  ;;  %v4891_v61 = vpop.f32.mrf.mxu0 }
 0x154   : > { %v4841_v41 = vpop.f32.mrf.mxu1 }
 0x155   : > { %v6309_v38 = vadd.f32 %v1949_v7, %v1662_v56  ;;  %v1665_v37 = vadd.f32 %v4841_v41, %v6166_v19  ;;  %v1959_v12 = vpop.f32.mrf.mxu0 }
 0x156   : > { %v1569_v22 = vpop.f32.mrf.mxu1 }
 0x157   : > { %v6312_v54 = vadd.f32 %v4891_v61, %v1665_v37  ;;  %v1664_v29 = vadd.f32 %v1569_v22, %v6172_v43  ;;  %v4894_v13 = vpop.f32.mrf.mxu0 }
 0x158   : > { %v4844_v59 = vpop.f32.mrf.mxu1 }
 0x159   : > { %v6315_v44 = vadd.f32 %v1959_v12, %v1664_v29  ;;  %v1667_v16 = vadd.f32 %v4844_v59, %v6180_v48  ;;  %v1969_v40 = vpop.f32.mrf.mxu0 }
 0x15a   : > { %v1579_v25 = vpop.f32.mrf.mxu1 }
 0x15b   : > { %v6318_v52 = vadd.f32 %v4894_v13, %v1667_v16  ;;  %v1666_v6 = vadd.f32 %v1579_v25, %v6186_v53  ;;  %v4897_v19 = vpop.f32.mrf.mxu0 }
 0x15c   : > { %v4847_v4 = vpop.f32.mrf.mxu1 }
 0x15d   : > { %6772 = vst [vmem:[#allocation13_spill] sm:$0xff] %v6318_v52  ;;  %v6321_v47 = vadd.f32 %v1969_v40, %v1666_v6  ;;  %v1669_v57 = vadd.f32 %v4847_v4, %v6194_v26  ;;  %v1979_v43 = vpop.f32.mrf.mxu0 }
 0x15e   : > { %v1589_v2 = vpop.f32.mrf.mxu1 }
 0x15f   : > { %6773 = vst [vmem:[#allocation14_spill] sm:$0xff] %v6321_v47  ;;  %v6324_v49 = vadd.f32 %v4897_v19, %v1669_v57  ;;  %v1668_v21 = vadd.f32 %v1589_v2, %v6200_v63  ;;  %v4900_v48 = vpop.f32.mrf.mxu0 }
 0x160   : > { %v4850_v20 = vpop.f32.mrf.mxu1 }
 0x161   : > { %6774 = vst [vmem:[#allocation15_spill] sm:$0xff] %v6324_v49  ;;  %v6327_v62 = vadd.f32 %v1979_v43, %v1668_v21  ;;  %v1671_v33 = vadd.f32 %v4850_v20, %v6209_v36  ;;  %v1989_v53 = vpop.f32.mrf.mxu0 }
 0x162   : > { %v1599_v10 = vpop.f32.mrf.mxu1 }
 0x163   : > { %6775 = vst [vmem:[#allocation16_spill] sm:$0xff] %v6327_v62  ;;  %v6330_v34 = vadd.f32 %v4900_v48, %v1671_v33  ;;  %v1670_v39 = vadd.f32 %v1599_v10, %v6215_v50  ;;  %v4903_v26 = vpop.f32.mrf.mxu0 }
 0x164   : > { %v4853_v24 = vpop.f32.mrf.mxu1 }
 0x165   : > { %6776 = vst [vmem:[#allocation17_spill] sm:$0xff] %v6330_v34  ;;  %v6333_v58 = vadd.f32 %v1989_v53, %v1670_v39  ;;  %v1673_v15 = vadd.f32 %v4853_v24, %v6222_v45  ;;  %v1999_v63 = vpop.f32.mrf.mxu0 }
 0x166   : > { %v1609_v7 = vpop.f32.mrf.mxu1 }
 0x167   : > { %6777 = vst [vmem:[#allocation18_spill] sm:$0xff] %v6333_v58  ;;  %v6336_v56 = vadd.f32 %v4903_v26, %v1673_v15  ;;  %v1672_v41 = vadd.f32 %v1609_v7, %v6227_v31  ;;  %v4906_v36 = vpop.f32.mrf.mxu0 }
 0x168   : > { %v4856_v61 = vpop.f32.mrf.mxu1 }
 0x169   : > { %6778 = vst [vmem:[#allocation19_spill] sm:$0xff] %v6336_v56  ;;  %v6339_v37 = vadd.f32 %v1999_v63, %v1672_v41  ;;  %v1675_v22 = vadd.f32 %v4856_v61, %v6236_v0  ;;  %v2009_v50 = vpop.f32.mrf.mxu0 }
 0x16a   : > { %v1619_v12 = vpop.f32.mrf.mxu1 }
 0x16b   : > { %6779 = vst [vmem:[#allocation20_spill] sm:$0xff] %v6339_v37  ;;  %v6342_v29 = vadd.f32 %v4906_v36, %v1675_v22  ;;  %v1674_v59 = vadd.f32 %v1619_v12, %v6243_v5  ;;  %v4909_v45 = vpop.f32.mrf.mxu0 }
 0x16c   : > { %v4859_v13 = vpop.f32.mrf.mxu1 }
 0x16d   : > { %6780 = vst [vmem:[#allocation21_spill] sm:$0xff] %v6342_v29  ;;  %v6345_v16 = vadd.f32 %v2009_v50, %v1674_v59  ;;  %v1677_v25 = vadd.f32 %v4859_v13, %v6250_v35  ;;  %v2019_v31 = vpop.f32.mrf.mxu0 }
 0x16e   : > { %v1629_v40 = vpop.f32.mrf.mxu1 }
 0x16f   : > { %6781 = vst [vmem:[#allocation22_spill] sm:$0xff] %v6345_v16  ;;  %v6348_v6 = vadd.f32 %v4909_v45, %v1677_v25  ;;  %v1676_v4 = vadd.f32 %v1629_v40, %v6255_v3  ;;  %v4912_v0 = vpop.f32.mrf.mxu0 }
 0x170   : > { %v4862_v19 = vpop.f32.mrf.mxu1 }
 0x171   : > { %6782 = vst [vmem:[#allocation23_spill] sm:$0xff] %v6348_v6  ;;  %v6351_v57 = vadd.f32 %v2019_v31, %v1676_v4  ;;  %v1679_v2 = vadd.f32 %v4862_v19, %v6258_v9  ;;  %v2029_v5 = vpop.f32.mrf.mxu0 }
 0x172   : > { %v1639_v43 = vpop.f32.mrf.mxu1 }
 0x173   : > { %6783 = vst [vmem:[#allocation24_spill] sm:$0xff] %v6351_v57  ;;  %v6354_v21 = vadd.f32 %v4912_v0, %v1679_v2  ;;  %v1678_v20 = vadd.f32 %v1639_v43, %v6261_v18  ;;  %v6357_v35 = vpop.f32.mrf.mxu0 }
 0x174   : > { %v4917_v48 = vpop.f32.mrf.mxu1 }
 0x175   : > { %6784 = vst [vmem:[#allocation25_spill] sm:$0xff] %v6354_v21  ;;  %v6359_v33 = vadd.f32 %v2029_v5, %v1678_v20  ;;  %v6361_v53 = vpop.f32.mrf.mxu0 }
 0x176   : > { %v2269_v10 = vpop.f32.mrf.mxu1 }
 0x177   : > { %6785 = vst [vmem:[#allocation26_spill] sm:$0xff] %v6359_v33  ;;  %v6365_v39 = vpop.f32.mrf.mxu0 }
 0x178   : > { %v6363_v3 = vpop.f32.mrf.mxu1 }
 0x179   : > { %v6369_v9 = vpop.f32.mrf.mxu0 }
 0x17a   : > { %v6367_v24 = vpop.f32.mrf.mxu1 }
 0x17b   : > { %v6373_v15 = vpop.f32.mrf.mxu0 }
 0x17c   : > { %v6371_v26 = vpop.f32.mrf.mxu1 }
 0x17d   : > { %v6377_v7 = vpop.f32.mrf.mxu0 }
 0x17e   : > { %v6375_v18 = vpop.f32.mrf.mxu1 }
 0x17f   : > { %v6381_v41 = vpop.f32.mrf.mxu0 }
 0x180   : > { %v6379_v63 = vpop.f32.mrf.mxu1 }
 0x181   : > { %v6385_v36 = vpop.f32.mrf.mxu0 }
 0x182   : > { %v6383_v61 = vpop.f32.mrf.mxu1 }
 0x183   : > { %v6389_v12 = vpop.f32.mrf.mxu0 }
 0x184   : > { %v6387_v22 = vpop.f32.mrf.mxu1 }
 0x185   : > { %v6393_v59 = vpop.f32.mrf.mxu0 }
 0x186   : > { %v6391_v50 = vpop.f32.mrf.mxu1 }
 0x187   : > { %v6397_v45 = vpop.f32.mrf.mxu0 }
 0x188   : > { %v6395_v13 = vpop.f32.mrf.mxu1 }
 0x189   : > { %v6401_v40 = vpop.f32.mrf.mxu0 }
 0x18a   : > { %v6399_v25 = vpop.f32.mrf.mxu1 }
 0x18b   : > { %v6405_v4 = vpop.f32.mrf.mxu0 }
 0x18c   : > { %v6403_v31 = vpop.f32.mrf.mxu1 }
 0x18d   : > { %v6409_v0 = vpop.f32.mrf.mxu0 }
 0x18e   : > { %v6407_v19 = vpop.f32.mrf.mxu1 }
 0x18f   : > { %v6413_v43 = vpop.f32.mrf.mxu0 }
 0x190   : > { %v6411_v2 = vpop.f32.mrf.mxu1 }
 0x191   : > { %v6417_v20 = vpop.f32.mrf.mxu0 }
 0x192   : > { %v6415_v5 = vpop.f32.mrf.mxu1 }
 0x193   : > { %v6421_v21 = vpop.f32.mrf.mxu0 }
 0x194   : > { %v6419_v33 = vpop.f32.mrf.mxu1 }
 0x195   : > { %v6425_v6 = vpop.f32.mrf.mxu0 }
 0x196   : > { %v6423_v57 = vpop.f32.mrf.mxu1  ;;  %6786 = vst [vmem:[#allocation27_spill] sm:$0xff] %v6425_v6 }
 0x197   : > { %v6429_v29 = vpop.f32.mrf.mxu0 }
 0x198   : > { %v6427_v16 = vpop.f32.mrf.mxu1  ;;  %6788 = vst [vmem:[#allocation29_spill] sm:$0xff] %v6429_v29 }
 0x199   : > { %6787 = vst [vmem:[#allocation28_spill] sm:$0xff] %v6427_v16  ;;  %v6433_v56 = vpop.f32.mrf.mxu0 }
 0x19a   : > { %v6431_v37 = vpop.f32.mrf.mxu1  ;;  %6790 = vst [vmem:[#allocation32_spill] sm:$0xff] %v6433_v56 }
 0x19b   : > { %6789 = vst [vmem:[#allocation31_spill] sm:$0xff] %v6431_v37  ;;  %v6437_v34 = vpop.f32.mrf.mxu0 }
 0x19c   : > { %v6435_v58 = vpop.f32.mrf.mxu1  ;;  %6792 = vst [vmem:[#allocation3_spill] sm:$0xff] %v6437_v34 }
 0x19d   : > { %6791 = vst [vmem:[#allocation30_spill] sm:$0xff] %v6435_v58  ;;  %v6441_v49 = vpop.f32.mrf.mxu0 }
 0x19e   : > { %v6439_v62 = vpop.f32.mrf.mxu1  ;;  %6794 = vst [vmem:[#allocation5_spill] sm:$0xff] %v6441_v49 }
 0x19f   : > { %6793 = vst [vmem:[#allocation4_spill] sm:$0xff] %v6439_v62  ;;  %v6445_v52 = vpop.f32.mrf.mxu0 }
 0x1a0   : > { %v6443_v47 = vpop.f32.mrf.mxu1  ;;  %6796 = vst [vmem:[#allocation7_spill] sm:$0xff] %v6445_v52 }
 0x1a1   : > { %6795 = vst [vmem:[#allocation33_spill] sm:$0xff] %v6443_v47  ;;  %v6449_v16 = vpop.f32.mrf.mxu0 }
 0x1a2   : > { %v6447_v6 = vpop.f32.mrf.mxu1  ;;  %6798 = vst [vmem:[#allocation2_spill] sm:$0xff] %v6449_v16 }
 0x1a3   : > { %6797 = vst [vmem:[#allocation6_spill] sm:$0xff] %v6447_v6  ;;  %v6453_v37 = vpop.f32.mrf.mxu0 }
 0x1a4   : > { %v6451_v29 = vpop.f32.mrf.mxu1  ;;  %6800 = vst [vmem:[#allocation8_spill] sm:$0xff] %v6453_v37 }
 0x1a5   : > { %6799 = vst [vmem:[#allocation9_spill] sm:$0xff] %v6451_v29  ;;  %v6457_v58 = vpop.f32.mrf.mxu0 }
 0x1a6   : > { %v6455_v56 = vpop.f32.mrf.mxu1  ;;  %6802 = vst [vmem:[#allocation11_spill] sm:$0xff] %v6457_v58 }
 0x1a7   : > { %6801 = vst [vmem:[#allocation10_spill] sm:$0xff] %v6455_v56  ;;  %v6461_v49 = vpop.f32.mrf.mxu0  ;;  %v2429_v56 = vadd.f32 %v4917_v48, %v6264_v32  ;;  %v2430_v48 = vadd.f32 %v6367_v24, %v6273_v46 }
 0x1a8   : > { %v6459_v34 = vpop.f32.mrf.mxu1  ;;  %6804 = vst [vmem:[#allocation34_spill] sm:$0xff] %v6461_v49  ;;  %v2428_v49 = vadd.f32 %v2269_v10, %v6267_v11  ;;  %v2433_v11 = vadd.f32 %v6371_v26, %v6276_v28  ;;  %v2432_v28 = vadd.f32 %v6375_v18, %v6279_v8  ;;  %v2434_v8 = vadd.f32 %v6383_v61, %v6285_v30 }
 0x1a9   : > { %6803 = vst [vmem:[#allocation12_spill] sm:$0xff] %v6459_v34  ;;  %v6465_v52 = vpop.f32.mrf.mxu0  ;;  %v2821_v46 = vadd.f32 %v6369_v9, %v2430_v48  ;;  %v2435_v9 = vadd.f32 %v6379_v63, %v6282_v27 }
 0x1aa   : > { %v6463_v47 = vpop.f32.mrf.mxu1  ;;  %6806 = vst [vmem:[#allocation36_spill] sm:$0xff] %v6465_v52  ;;  %v2820_v52 = vadd.f32 %v6357_v35, %v2429_v56  ;;  %v2819_v32 = vadd.f32 %v6361_v53, %v2428_v49  ;;  %v2824_v24 = vadd.f32 %v6373_v15, %v2433_v11  ;;  %v2823_v48 = vadd.f32 %v6377_v7, %v2432_v28 }
 0x1ab   : > { %6805 = vst [vmem:[#allocation35_spill] sm:$0xff] %v6463_v47  ;;  %v6469_v16 = vpop.f32.mrf.mxu0  ;;  %v2826_v30 = vadd.f32 %v6381_v41, %v2435_v9  ;;  %v2825_v7 = vadd.f32 %v6385_v36, %v2434_v8 }
 0x1ac   : > { %v6467_v6 = vpop.f32.mrf.mxu1  ;;  %6807 = vst [vmem:[#allocation37_spill] sm:$0xff] %v6469_v16  ;;  %v2431_v16 = vadd.f32 %v6363_v3, %v6270_v23 }
 0x1ad   : > { %v6473_v37 = vpop.f32.mrf.mxu0 }
 0x1ae   : > { %v6471_v29 = vpop.f32.mrf.mxu1  ;;  %6809 = vst [vmem:[#allocation39_spill] sm:$0xff] %v6473_v37  ;;  %v2822_v35 = vadd.f32 %v6365_v39, %v2431_v16 }
 0x1af   : > { %6808 = vst [vmem:[#allocation38_spill] sm:$0xff] %v6471_v29  ;;  %v6478_v34 = vpop.f32.mrf.mxu0 }
 0x1b0   : > { %v6476_v58 = vpop.f32.mrf.mxu1  ;;  %6810 = vst [vmem:[#allocation40_spill] sm:$0xff] %v6478_v34 }
 0x1b1   : > { %v6483_v47 = vpop.f32.mrf.mxu0 }
 0x1b2   : > { %v6481_v62 = vpop.f32.mrf.mxu1  ;;  %6812 = vst [vmem:[#allocation42_spill] sm:$0xff] %v6483_v47 }
 0x1b3   : > { %6811 = vst [vmem:[#allocation41_spill] sm:$0xff] %v6481_v62  ;;  %v5067_v37 = vpop.f32.mrf.mxu0 }
 0x1b4   : > { %v5017_v29 = vpop.f32.mrf.mxu1 }
 0x1b5   : > { %v3210_v34 = vadd.f32 %v5017_v29, %v2820_v52  ;;  %v3440_v23 = vpop.f32.mrf.mxu0 }
 0x1b6   : > { %v3050_v56 = vpop.f32.mrf.mxu1 }
 0x1b7   : > { %v3600_v10 = vadd.f32 %v5067_v37, %v3210_v34  ;;  %v3209_v49 = vadd.f32 %v3050_v56, %v2819_v32  ;;  %v5070_v3 = vpop.f32.mrf.mxu0 }
 0x1b8   : > { %v5020_v53 = vpop.f32.mrf.mxu1 }
 0x1b9   : > { %3632 = vst [vmem:[%s6497_s14 + $0x8] sm:$0xff] %v3600_v10  ;;  %v3599_v52 = vadd.f32 %v3440_v23, %v3209_v49  ;;  %v3212_v29 = vadd.f32 %v5020_v53, %v2822_v35  ;;  %v3702_v26 = vmul.f32 %v3600_v10, %v3600_v10  ;;  %v3450_v62 = vpop.f32.mrf.mxu0  ;;  %v2437_v23 = vadd.f32 %v6387_v22, %v6288_v17 }
 0x1ba   : > { %v3060_v47 = vpop.f32.mrf.mxu1  ;;  %v2436_v22 = vadd.f32 %v6391_v50, %v6291_v55 }
 0x1bb   : > { %3631 = vst [vmem:[%s6497_s14] sm:$0xff] %v3599_v52  ;;  %v3663_v16 = vadd.f32 %v3600_v10, %v3599_v52  ;;  %v3701_v34 = vmul.f32 %v3599_v52, %v3599_v52  ;;  %v3602_v37 = vadd.f32 %v5070_v3, %v3212_v29  ;;  %v3211_v39 = vadd.f32 %v3060_v47, %v2821_v46  ;;  %v5073_v32 = vpop.f32.mrf.mxu0 }
 0x1bc   : > { %v5023_v18 = vpop.f32.mrf.mxu1  ;;  %v2828_v17 = vadd.f32 %v6389_v12, %v2437_v23  ;;  %v2439_v52 = vadd.f32 %v6395_v13, %v6294_v14 }
 0x1bd   : > { %v3733_v15 = vadd.f32 %v3702_v26, %v3701_v34  ;;  %3634 = vst [vmem:[%s6497_s14 + $0x18] sm:$0xff] %v3602_v37  ;;  %v3601_v11 = vadd.f32 %v3450_v62, %v3211_v39  ;;  %v3214_v56 = vadd.f32 %v5023_v18, %v2824_v24  ;;  %v3460_v47 = vpop.f32.mrf.mxu0  ;;  %v3704_v62 = vmul.f32 %v3602_v37, %v3602_v37 }
 0x1be   : > { %v3070_v35 = vpop.f32.mrf.mxu1  ;;  %v2827_v18 = vadd.f32 %v6393_v59, %v2436_v22 }
 0x1bf   : > { %3633 = vst [vmem:[%s6497_s14 + $0x10] sm:$0xff] %v3601_v11  ;;  %v3664_v10 = vadd.f32 %v3663_v16, %v3601_v11  ;;  %v3703_v27 = vmul.f32 %v3601_v11, %v3601_v11  ;;  %v3604_v63 = vadd.f32 %v5073_v32, %v3214_v56  ;;  %v3213_v49 = vadd.f32 %v3070_v35, %v2823_v48  ;;  %v5076_v53 = vpop.f32.mrf.mxu0 }
 0x1c0   : > { %v5026_v61 = vpop.f32.mrf.mxu1  ;;  %v2830_v32 = vadd.f32 %v6397_v45, %v2439_v52  ;;  %v2441_v48 = vadd.f32 %v6403_v31, %v6300_v60 }
 0x1c1   : > { %v3734_v3 = vadd.f32 %v3733_v15, %v3703_v27  ;;  %3636 = vst [vmem:[%s6497_s14 + $0x28] sm:$0xff] %v3604_v63  ;;  %v3603_v46 = vadd.f32 %v3460_v47, %v3213_v49  ;;  %v3665_v28 = vadd.f32 %v3664_v10, %v3602_v37  ;;  %v3216_v29 = vadd.f32 %v5026_v61, %v2826_v30  ;;  %v3470_v41 = vpop.f32.mrf.mxu0 }
 0x1c2   : > { %v3080_v24 = vpop.f32.mrf.mxu1  ;;  %v2438_v37 = vadd.f32 %v6399_v25, %v6297_v51  ;;  %v3706_v12 = vmul.f32 %v3604_v63, %v3604_v63  ;;  %v2440_v47 = vadd.f32 %v6407_v19, %v6303_v42  ;;  %v2832_v49 = vadd.f32 %v6405_v4, %v2441_v48 }
 0x1c3   : > { %3635 = vst [vmem:[%s6497_s14 + $0x20] sm:$0xff] %v3603_v46  ;;  %v3666_v36 = vadd.f32 %v3665_v28, %v3603_v46  ;;  %v3705_v26 = vmul.f32 %v3603_v46, %v3603_v46  ;;  %v3735_v16 = vadd.f32 %v3734_v3, %v3704_v62  ;;  %v3215_v34 = vadd.f32 %v3080_v24, %v2825_v7  ;;  %v5079_v55 = vpop.f32.mrf.mxu0 }
 0x1c4   : > { %v3606_v39 = vadd.f32 %v5076_v53, %v3216_v29  ;;  %v5029_v9 = vpop.f32.mrf.mxu1  ;;  %v2829_v35 = vadd.f32 %v6401_v40, %v2438_v37  ;;  %v2443_v40 = vadd.f32 %v6411_v2, %v6306_v1  ;;  %v2442_v4 = vadd.f32 %v6415_v5, %v6309_v38 }
 0x1c5   : > { %v3736_v50 = vadd.f32 %v3735_v16, %v3705_v26  ;;  %v3605_v8 = vadd.f32 %v3470_v41, %v3215_v34  ;;  %v3667_v14 = vadd.f32 %v3666_v36, %v3604_v63  ;;  %v3218_v13 = vadd.f32 %v5029_v9, %v2828_v17  ;;  %v3480_v11 = vpop.f32.mrf.mxu0 }
 0x1c6   : > { %3638 = vst [vmem:[%s6497_s14 + $0x38] sm:$0xff] %v3606_v39  ;;  %v3090_v15 = vpop.f32.mrf.mxu1  ;;  %v3708_v27 = vmul.f32 %v3606_v39, %v3606_v39  ;;  %v2831_v17 = vadd.f32 %v6409_v0, %v2440_v47  ;;  %v2445_v1 = vadd.f32 %v6419_v33, %v6312_v54  ;;  %v2834_v26 = vadd.f32 %v6413_v43, %v2443_v40 }
 0x1c7   : > { %3637 = vst [vmem:[%s6497_s14 + $0x30] sm:$0xff] %v3605_v8  ;;  %v3668_v51 = vadd.f32 %v3667_v14, %v3605_v8  ;;  %v3707_v25 = vmul.f32 %v3605_v8, %v3605_v8  ;;  %v3737_v56 = vadd.f32 %v3736_v50, %v3706_v12  ;;  %v3608_v23 = vadd.f32 %v5079_v55, %v3218_v13  ;;  %v5082_v10 = vpop.f32.mrf.mxu0 }
 0x1c8   : > { %v3217_v59 = vadd.f32 %v3090_v15, %v2827_v18  ;;  %v5032_v45 = vpop.f32.mrf.mxu1  ;;  %v2444_v54 = vadd.f32 %v6423_v57, %v6315_v44  ;;  %v2836_v55 = vadd.f32 %v6421_v21, %v2445_v1  ;;  %v6813_v18 = vld [vmem:[#allocation13_spill] sm:$0xff] }
 0x1c9   : > { %v3738_v60 = vadd.f32 %v3737_v56, %v3707_v25  ;;  %3640 = vst [vmem:[%s6497_s14 + $0x48] sm:$0xff] %v3608_v23  ;;  %v3669_v31 = vadd.f32 %v3668_v51, %v3606_v39  ;;  %v3220_v63 = vadd.f32 %v5032_v45, %v2830_v32  ;;  %v3490_v61 = vpop.f32.mrf.mxu0  ;;  %v3710_v2 = vmul.f32 %v3608_v23, %v3608_v23  ;;  %v6814_v32 = vld [vmem:[#allocation28_spill] sm:$0xff]  ;;  %v6815_v56 = vld [vmem:[#allocation27_spill] sm:$0xff] }
 0x1ca   : > { %v3607_v30 = vadd.f32 %v3480_v11, %v3217_v59  ;;  %v3100_v7 = vpop.f32.mrf.mxu1  ;;  %v2833_v39 = vadd.f32 %v6417_v20, %v2442_v4  ;;  %v2447_v48 = vadd.f32 %v6814_v32, %v6813_v18  ;;  %v2835_v21 = vadd.f32 %v6815_v56, %v2444_v54 }
 0x1cb   : > { %v3739_v53 = vadd.f32 %v3738_v60, %v3708_v27  ;;  %v3610_v42 = vadd.f32 %v5082_v10, %v3220_v63  ;;  %v3219_v19 = vadd.f32 %v3100_v7, %v2829_v35  ;;  %v5085_v28 = vpop.f32.mrf.mxu0  ;;  %v6817_v35 = vld [vmem:[#allocation31_spill] sm:$0xff]  ;;  %v6819_v27 = vld [vmem:[#allocation30_spill] sm:$0xff] }
 0x1cc   : > { %3639 = vst [vmem:[%s6497_s14 + $0x40] sm:$0xff] %v3607_v30  ;;  %v3670_v62 = vadd.f32 %v3669_v31, %v3607_v30  ;;  %v3709_v3 = vmul.f32 %v3607_v30, %v3607_v30  ;;  %v5035_v46 = vpop.f32.mrf.mxu1  ;;  %v6818_v10 = vld [vmem:[#allocation15_spill] sm:$0xff] }
 0x1cd   : > { %3642 = vst [vmem:[%s6497_s14 + $0x58] sm:$0xff] %v3610_v42  ;;  %v3609_v22 = vadd.f32 %v3490_v61, %v3219_v19  ;;  %v3222_v52 = vadd.f32 %v5035_v46, %v2832_v49  ;;  %v3500_v36 = vpop.f32.mrf.mxu0  ;;  %v3712_v43 = vmul.f32 %v3610_v42, %v3610_v42  ;;  %v2449_v60 = vadd.f32 %v6819_v27, %v6818_v10  ;;  %v6820_v61 = vld [vmem:[#allocation29_spill] sm:$0xff] }
 0x1ce   : > { %v3740_v29 = vadd.f32 %v3739_v53, %v3709_v3  ;;  %v3671_v24 = vadd.f32 %v3670_v62, %v3608_v23  ;;  %v3110_v41 = vpop.f32.mrf.mxu1  ;;  %v6816_v23 = vld [vmem:[#allocation14_spill] sm:$0xff]  ;;  %v2838_v40 = vadd.f32 %v6820_v61, %v2447_v48 }
 0x1cf   : > { %3641 = vst [vmem:[%s6497_s14 + $0x50] sm:$0xff] %v3609_v22  ;;  %v3711_v16 = vmul.f32 %v3609_v22, %v3609_v22  ;;  %v3612_v0 = vadd.f32 %v5085_v28, %v3222_v52  ;;  %v3221_v34 = vadd.f32 %v3110_v41, %v2831_v17  ;;  %v5088_v12 = vpop.f32.mrf.mxu0  ;;  %v2446_v47 = vadd.f32 %v6817_v35, %v6816_v23  ;;  %v6821_v17 = vld [vmem:[#allocation32_spill] sm:$0xff] }
 0x1d0   : > { %v3672_v37 = vadd.f32 %v3671_v24, %v3609_v22  ;;  %v3741_v38 = vadd.f32 %v3740_v29, %v3710_v2  ;;  %v5038_v5 = vpop.f32.mrf.mxu1  ;;  %v6822_v22 = vld [vmem:[#allocation16_spill] sm:$0xff]  ;;  %v6824_v24 = vld [vmem:[#allocation3_spill] sm:$0xff] }
 0x1d1   : > { %3644 = vst [vmem:[%s6497_s14 + $0x68] sm:$0xff] %v3612_v0  ;;  %v3611_v33 = vadd.f32 %v3500_v36, %v3221_v34  ;;  %v3224_v9 = vadd.f32 %v5038_v5, %v2834_v26  ;;  %v3510_v13 = vpop.f32.mrf.mxu0  ;;  %v3714_v31 = vmul.f32 %v3612_v0, %v3612_v0  ;;  %v2837_v4 = vadd.f32 %v6821_v17, %v2446_v47  ;;  %v6823_v52 = vld [vmem:[#allocation4_spill] sm:$0xff]  ;;  %v6837_v17 = vld [vmem:[#allocation21_spill] sm:$0xff] }
 0x1d2   : > { %v3742_v50 = vadd.f32 %v3741_v38, %v3711_v16  ;;  %v3673_v8 = vadd.f32 %v3672_v37, %v3610_v42  ;;  %v3120_v14 = vpop.f32.mrf.mxu1  ;;  %v2448_v1 = vadd.f32 %v6823_v52, %v6822_v22  ;;  %v2840_v41 = vadd.f32 %v6824_v24, %v2449_v60  ;;  %v6825_v37 = vld [vmem:[#allocation17_spill] sm:$0xff] }
 0x1d3   : > { %3643 = vst [vmem:[%s6497_s14 + $0x60] sm:$0xff] %v3611_v33  ;;  %v3713_v15 = vmul.f32 %v3611_v33, %v3611_v33  ;;  %v3614_v20 = vadd.f32 %v5088_v12, %v3224_v9  ;;  %v3223_v11 = vadd.f32 %v3120_v14, %v2833_v39  ;;  %v5091_v25 = vpop.f32.mrf.mxu0  ;;  %v6826_v38 = vld [vmem:[#allocation33_spill] sm:$0xff]  ;;  %v6828_v14 = vld [vmem:[#allocation18_spill] sm:$0xff] }
 0x1d4   : > { %v3674_v51 = vadd.f32 %v3673_v8, %v3611_v33  ;;  %v3743_v44 = vadd.f32 %v3742_v50, %v3712_v43  ;;  %v5041_v57 = vpop.f32.mrf.mxu1  ;;  %v2451_v5 = vadd.f32 %v6826_v38, %v6825_v37  ;;  %v6827_v50 = vld [vmem:[#allocation5_spill] sm:$0xff] }
 0x1d5   : > { %3646 = vst [vmem:[%s6497_s14 + $0x78] sm:$0xff] %v3614_v20  ;;  %v3613_v59 = vadd.f32 %v3510_v13, %v3223_v11  ;;  %v3226_v45 = vadd.f32 %v5041_v57, %v2836_v55  ;;  %v3520_v7 = vpop.f32.mrf.mxu0  ;;  %v3716_v36 = vmul.f32 %v3614_v20, %v3614_v20  ;;  %v2839_v8 = vadd.f32 %v6827_v50, %v2448_v1  ;;  %v6829_v13 = vld [vmem:[#allocation6_spill] sm:$0xff] }
 0x1d6   : > { %v3744_v63 = vadd.f32 %v3743_v44, %v3713_v15  ;;  %v3675_v49 = vadd.f32 %v3674_v51, %v3612_v0  ;;  %v3130_v30 = vpop.f32.mrf.mxu1  ;;  %v2450_v18 = vadd.f32 %v6829_v13, %v6828_v14  ;;  %v6830_v15 = vld [vmem:[#allocation19_spill] sm:$0xff]  ;;  %v6843_v50 = vld [vmem:[#allocation34_spill] sm:$0xff] }
 0x1d7   : > { %3645 = vst [vmem:[%s6497_s14 + $0x70] sm:$0xff] %v3613_v59  ;;  %v3715_v53 = vmul.f32 %v3613_v59, %v3613_v59  ;;  %v3616_v42 = vadd.f32 %v5091_v25, %v3226_v45  ;;  %v3225_v19 = vadd.f32 %v3130_v30, %v2835_v21  ;;  %v5094_v28 = vpop.f32.mrf.mxu0  ;;  %v6832_v21 = vld [vmem:[#allocation7_spill] sm:$0xff]  ;;  %v6835_v30 = vld [vmem:[#allocation10_spill] sm:$0xff] }
 0x1d8   : > { %v3676_v62 = vadd.f32 %v3675_v49, %v3613_v59  ;;  %v3745_v3 = vadd.f32 %v3744_v63, %v3714_v31  ;;  %v5044_v46 = vpop.f32.mrf.mxu1  ;;  %v2842_v23 = vadd.f32 %v6832_v21, %v2451_v5  ;;  %v6833_v31 = vld [vmem:[#allocation2_spill] sm:$0xff]  ;;  %v6834_v49 = vld [vmem:[#allocation20_spill] sm:$0xff]  ;;  %v6847_v21 = vld [vmem:[#allocation37_spill] sm:$0xff] }
 0x1d9   : > { %3648 = vst [vmem:[%s6497_s14 + $0x88] sm:$0xff] %v3616_v42  ;;  %v3615_v2 = vadd.f32 %v3520_v7, %v3225_v19  ;;  %v3228_v29 = vadd.f32 %v5044_v46, %v2838_v40  ;;  %v3530_v34 = vpop.f32.mrf.mxu0  ;;  %v3718_v51 = vmul.f32 %v3616_v42, %v3616_v42  ;;  %v2841_v63 = vadd.f32 %v6833_v31, %v2450_v18 }
 0x1da   : > { %v3746_v26 = vadd.f32 %v3745_v3, %v3715_v53  ;;  %v3677_v16 = vadd.f32 %v3676_v62, %v3614_v20  ;;  %v3140_v0 = vpop.f32.mrf.mxu1  ;;  %v6831_v20 = vld [vmem:[#allocation9_spill] sm:$0xff]  ;;  %v2452_v7 = vadd.f32 %v6835_v30, %v6834_v49  ;;  %v6836_v53 = vld [vmem:[#allocation8_spill] sm:$0xff] }
 0x1db   : > { %3647 = vst [vmem:[%s6497_s14 + $0x80] sm:$0xff] %v3615_v2  ;;  %v3717_v12 = vmul.f32 %v3615_v2, %v3615_v2  ;;  %v3618_v39 = vadd.f32 %v5094_v28, %v3228_v29  ;;  %v3227_v54 = vadd.f32 %v3140_v0, %v2837_v4  ;;  %v5097_v43 = vpop.f32.mrf.mxu0  ;;  %v2453_v11 = vadd.f32 %v6831_v20, %v6830_v15  ;;  %v6838_v4 = vld [vmem:[#allocation12_spill] sm:$0xff]  ;;  %v6840_v0 = vld [vmem:[#allocation22_spill] sm:$0xff] }
 0x1dc   : > { %v3678_v33 = vadd.f32 %v3677_v16, %v3615_v2  ;;  %v3747_v9 = vadd.f32 %v3746_v26, %v3716_v36  ;;  %v5047_v55 = vpop.f32.mrf.mxu1  ;;  %v2455_v22 = vadd.f32 %v6838_v4, %v6837_v17  ;;  %v6839_v26 = vld [vmem:[#allocation11_spill] sm:$0xff] }
 0x1dd   : > { %3650 = vst [vmem:[%s6497_s14 + $0x98] sm:$0xff] %v3618_v39  ;;  %v3617_v32 = vadd.f32 %v3530_v34, %v3227_v54  ;;  %v3230_v48 = vadd.f32 %v5047_v55, %v2840_v41  ;;  %v3540_v56 = vpop.f32.mrf.mxu0  ;;  %v3720_v19 = vmul.f32 %v3618_v39, %v3618_v39  ;;  %v2843_v16 = vadd.f32 %v6839_v26, %v2452_v7  ;;  %v6841_v34 = vld [vmem:[#allocation35_spill] sm:$0xff] }
 0x1de   : > { %v3748_v44 = vadd.f32 %v3747_v9, %v3717_v12  ;;  %v3679_v57 = vadd.f32 %v3678_v33, %v3616_v42  ;;  %v3150_v25 = vpop.f32.mrf.mxu1  ;;  %v2844_v42 = vadd.f32 %v6836_v53, %v2453_v11  ;;  %v2454_v37 = vadd.f32 %v6841_v34, %v6840_v0  ;;  %v6842_v12 = vld [vmem:[#allocation23_spill] sm:$0xff]  ;;  %v6844_v11 = vld [vmem:[#allocation36_spill] sm:$0xff]  ;;  %v6853_v34 = vld [vmem:[#allocation42_spill] sm:$0xff] }
 0x1df   : > { %3649 = vst [vmem:[%s6497_s14 + $0x90] sm:$0xff] %v3617_v32  ;;  %v3719_v35 = vmul.f32 %v3617_v32, %v3617_v32  ;;  %v3620_v47 = vadd.f32 %v5097_v43, %v3230_v48  ;;  %v3229_v59 = vadd.f32 %v3150_v25, %v2839_v8  ;;  %v5100_v60 = vpop.f32.mrf.mxu0  ;;  %v2846_v8 = vadd.f32 %v6843_v50, %v2455_v22  ;;  %v6849_v53 = vld [vmem:[#allocation39_spill] sm:$0xff] }
 0x1e0   : > { %v3680_v45 = vadd.f32 %v3679_v57, %v3617_v32  ;;  %v3749_v10 = vadd.f32 %v3748_v44, %v3718_v51  ;;  %v5050_v27 = vpop.f32.mrf.mxu1  ;;  %v2845_v51 = vadd.f32 %v6844_v11, %v2454_v37  ;;  %v6846_v44 = vld [vmem:[#allocation38_spill] sm:$0xff] }
 0x1e1   : > { %3652 = vst [vmem:[%s6497_s14 + $0xa8] sm:$0xff] %v3620_v47  ;;  %v3619_v61 = vadd.f32 %v3540_v56, %v3229_v59  ;;  %v3232_v40 = vadd.f32 %v5050_v27, %v2842_v23  ;;  %v3550_v28 = vpop.f32.mrf.mxu0  ;;  %v3722_v54 = vmul.f32 %v3620_v47, %v3620_v47  ;;  %v6848_v27 = vld [vmem:[#allocation25_spill] sm:$0xff] }
 0x1e2   : > { %v3750_v62 = vadd.f32 %v3749_v10, %v3719_v35  ;;  %v3681_v3 = vadd.f32 %v3680_v45, %v3618_v39  ;;  %v3160_v46 = vpop.f32.mrf.mxu1  ;;  %v2457_v39 = vadd.f32 %v6467_v6, %v6842_v12  ;;  %v6845_v6 = vld [vmem:[#allocation24_spill] sm:$0xff] }
 0x1e3   : > { %3651 = vst [vmem:[%s6497_s14 + $0xa0] sm:$0xff] %v3619_v61  ;;  %v3721_v52 = vmul.f32 %v3619_v61, %v3619_v61  ;;  %v3622_v1 = vadd.f32 %v5100_v60, %v3232_v40  ;;  %v3231_v2 = vadd.f32 %v3160_v46, %v2841_v63  ;;  %v5103_v36 = vpop.f32.mrf.mxu0  ;;  %v2456_v57 = vadd.f32 %v6846_v44, %v6845_v6 }
 0x1e4   : > { %v3682_v29 = vadd.f32 %v3681_v3, %v3619_v61  ;;  %v3751_v24 = vadd.f32 %v3750_v62, %v3720_v19  ;;  %v5053_v41 = vpop.f32.mrf.mxu1  ;;  %v2848_v23 = vadd.f32 %v6847_v21, %v2457_v39  ;;  %v2459_v60 = vadd.f32 %v6476_v58, %v6848_v27  ;;  %v6850_v19 = vld [vmem:[#allocation26_spill] sm:$0xff]  ;;  %v6851_v62 = vld [vmem:[#allocation41_spill] sm:$0xff] }
 0x1e5   : > { %3654 = vst [vmem:[%s6497_s14 + $0xb8] sm:$0xff] %v3622_v1  ;;  %v3621_v38 = vadd.f32 %v3550_v28, %v3231_v2  ;;  %v3234_v5 = vadd.f32 %v5053_v41, %v2844_v42  ;;  %v3560_v43 = vpop.f32.mrf.mxu0  ;;  %v3724_v35 = vmul.f32 %v3622_v1, %v3622_v1  ;;  %v2847_v42 = vadd.f32 %v6849_v53, %v2456_v57 }
 0x1e6   : > { %v3752_v33 = vadd.f32 %v3751_v24, %v3721_v52  ;;  %v3683_v9 = vadd.f32 %v3682_v29, %v3620_v47  ;;  %v3170_v55 = vpop.f32.mrf.mxu1  ;;  %v2458_v3 = vadd.f32 %v6851_v62, %v6850_v19 }
 0x1e7   : > { %3653 = vst [vmem:[%s6497_s14 + $0xb0] sm:$0xff] %v3621_v38  ;;  %v3723_v14 = vmul.f32 %v3621_v38, %v3621_v38  ;;  %v3624_v13 = vadd.f32 %v5103_v36, %v3234_v5  ;;  %v3233_v18 = vadd.f32 %v3170_v55, %v2843_v16  ;;  %v5106_v20 = vpop.f32.mrf.mxu0 }
 0x1e8   : > { %v3684_v32 = vadd.f32 %v3683_v9, %v3621_v38  ;;  %v3753_v48 = vadd.f32 %v3752_v33, %v3722_v54  ;;  %v5056_v15 = vpop.f32.mrf.mxu1  ;;  %v2849_v37 = vadd.f32 %v6853_v34, %v2458_v3 }
 0x1e9   : > { %3656 = vst [vmem:[%s6497_s14 + $0xc8] sm:$0xff] %v3624_v13  ;;  %v3623_v25 = vadd.f32 %v3560_v43, %v3233_v18  ;;  %v3236_v56 = vadd.f32 %v5056_v15, %v2846_v8  ;;  %v3570_v10 = vpop.f32.mrf.mxu0  ;;  %v3726_v17 = vmul.f32 %v3624_v13, %v3624_v13 }
 0x1ea   : > { %v3754_v47 = vadd.f32 %v3753_v48, %v3723_v14  ;;  %v3685_v59 = vadd.f32 %v3684_v32, %v3622_v1  ;;  %v3180_v45 = vpop.f32.mrf.mxu1  ;;  %v6852_v1 = vld [vmem:[#allocation40_spill] sm:$0xff] }
 0x1eb   : > { %3655 = vst [vmem:[%s6497_s14 + $0xc0] sm:$0xff] %v3623_v25  ;;  %v3725_v31 = vmul.f32 %v3623_v25, %v3623_v25  ;;  %v3626_v63 = vadd.f32 %v5106_v20, %v3236_v56  ;;  %v3235_v49 = vadd.f32 %v3180_v45, %v2845_v51  ;;  %v5109_v40 = vpop.f32.mrf.mxu0  ;;  %v2850_v2 = vadd.f32 %v6852_v1, %v2459_v60 }
 0x1ec   : > { %v3686_v30 = vadd.f32 %v3685_v59, %v3623_v25  ;;  %v3755_v7 = vadd.f32 %v3754_v47, %v3724_v35  ;;  %v5059_v61 = vpop.f32.mrf.mxu1 }
 0x1ed   : > { %3658 = vst [vmem:[%s6497_s14 + $0xd8] sm:$0xff] %v3626_v63  ;;  %v3625_v46 = vadd.f32 %v3570_v10, %v3235_v49  ;;  %v3238_v28 = vadd.f32 %v5059_v61, %v2848_v23  ;;  %v3580_v52 = vpop.f32.mrf.mxu0  ;;  %v3728_v12 = vmul.f32 %v3626_v63, %v3626_v63 }
 0x1ee   : > { %v3756_v58 = vadd.f32 %v3755_v7, %v3725_v31  ;;  %v3687_v4 = vadd.f32 %v3686_v30, %v3624_v13  ;;  %v3190_v22 = vpop.f32.mrf.mxu1 }
 0x1ef   : > { %3657 = vst [vmem:[%s6497_s14 + $0xd0] sm:$0xff] %v3625_v46  ;;  %v3727_v29 = vmul.f32 %v3625_v46, %v3625_v46  ;;  %v3628_v24 = vadd.f32 %v5109_v40, %v3238_v28  ;;  %v3237_v41 = vadd.f32 %v3190_v22, %v2847_v42  ;;  %v5112_v0 = vpop.f32.mrf.mxu0 }
 0x1f0   : > { %v3688_v36 = vadd.f32 %v3687_v4, %v3625_v46  ;;  %v3757_v26 = vadd.f32 %v3756_v58, %v3726_v17  ;;  %v5062_v16 = vpop.f32.mrf.mxu1 }
 0x1f1   : > { %3660 = vst [vmem:[%s6497_s14 + $0xe8] sm:$0xff] %v3628_v24  ;;  %v3627_v38 = vadd.f32 %v3580_v52, %v3237_v41  ;;  %v3240_v5 = vadd.f32 %v5062_v16, %v2850_v2  ;;  %v3590_v14 = vpop.f32.mrf.mxu0  ;;  %v3730_v18 = vmul.f32 %v3628_v24, %v3628_v24 }
 0x1f2   : > { %v3758_v39 = vadd.f32 %v3757_v26, %v3727_v29  ;;  %v3689_v54 = vadd.f32 %v3688_v36, %v3626_v63  ;;  %v3200_v33 = vpop.f32.mrf.mxu1 }
 0x1f3   : > { %3659 = vst [vmem:[%s6497_s14 + $0xe0] sm:$0xff] %v3627_v38  ;;  %v3729_v9 = vmul.f32 %v3627_v38, %v3627_v38  ;;  %v3630_v55 = vadd.f32 %v5112_v0, %v3240_v5  ;;  %v3239_v43 = vadd.f32 %v3200_v33, %v2849_v37 }
 0x1f4   : > { %v3690_v50 = vadd.f32 %v3689_v54, %v3627_v38  ;;  %v3759_v8 = vadd.f32 %v3758_v39, %v3728_v12 }
 0x1f5   : > { %3662 = vst [vmem:[%s6497_s14 + $0xf8] sm:$0xff] %v3630_v55  ;;  %v3629_v13 = vadd.f32 %v3590_v14, %v3239_v43  ;;  %v3732_v51 = vmul.f32 %v3630_v55, %v3630_v55 }
 0x1f6   : > { %v3760_v32 = vadd.f32 %v3759_v8, %v3729_v9  ;;  %v3691_v48 = vadd.f32 %v3690_v50, %v3628_v24 }
 0x1f7   : > { %3661 = vst [vmem:[%s6497_s14 + $0xf0] sm:$0xff] %v3629_v13  ;;  %v3731_v15 = vmul.f32 %v3629_v13, %v3629_v13 }
 0x1f8   : > { %v3692_v20 = vadd.f32 %v3691_v48, %v3629_v13  ;;  %v3761_v11 = vadd.f32 %v3760_v32, %v3730_v18 }
 0x1fa   : > { %v3693_v6 = vadd.f32 %v3692_v20, %v3630_v55  ;;  %v3762_v44 = vadd.f32 %v3761_v11, %v3731_v15 }
 0x1fc   : > { %v3694_v57 = vrot.slane %v3693_v6, 4  ;;  %v3763_v25 = vadd.f32 %v3762_v44, %v3732_v51 }
 0x1fe   : > { %v3695_v56 = vadd.f32 %v3694_v57, %v3693_v6  ;;  %v3764_v21 = vrot.slane %v3763_v25, 4 }
 0x200   : > { %v3696_v23 = vrot.slane %v3695_v56, 2  ;;  %v3765_v35 = vadd.f32 %v3764_v21, %v3763_v25 }
 0x202   : > { %v3697_v47 = vadd.f32 %v3696_v23, %v3695_v56  ;;  %v3766_v59 = vrot.slane %v3765_v35, 2 }
 0x204   : > { %v3698_v45 = vrot.slane %v3697_v47, 1  ;;  %v3767_v10 = vadd.f32 %v3766_v59, %v3765_v35 }
 0x206   : > { %v3699_v27 = vadd.f32 %v3698_v45, %v3697_v47  ;;  %v3768_v60 = vrot.slane %v3767_v10, 1 }
 0x208   : > { %3700 = vst [vmem:[%s181_s18] sm:$0x1] %v3699_v27  ;;  %v3769_v31 = vadd.f32 %v3768_v60, %v3767_v10 }
 0x20a   : > { %3770 = vst [vmem:[%s181_s18 + $0x1] sm:$0x1] %v3769_v31 }
 0x20b PF: > { %s14_s12 = sadd.s32 1, %s5130_s12  }
 0x20c   : > { %p11_p4 = scmp.ge.s32.totalorder %s14_s12, 4  }
 0x20e   :  { %13 = sbr.rel (!%p11_p4) target bundleno = 1 (0x1), region = 80 }

</bundles_post_ra>
